<compile_context>
chip_gen: v7x
topology: tpu7x:2x2x1
jax: 0.10.0
libtpu: 0.0.40
codegen_flags: <defaults>
</compile_context>

<pallas_src>
import jax
import jax.numpy as jnp
from jax import lax
from jax.experimental import pallas as pl
from jax.experimental.pallas import tpu as pltpu


def lstm_decoder(x, hidden, cell, w_ih, w_hh, b_ih, b_hh):
    """Pallas LSTM forward (PyTorch nn.LSTM semantics, gate order i,f,g,o).

    x:      (T, B, I)
    hidden: (1, B, H)
    cell:   (1, B, H)
    w_ih:   (4H, I)  PyTorch layout
    w_hh:   (4H, H)
    b_ih, b_hh: (4H,)
    """
    x = jnp.asarray(x, jnp.float32)
    hidden = jnp.asarray(hidden, jnp.float32)
    cell = jnp.asarray(cell, jnp.float32)
    w_ih = jnp.asarray(w_ih, jnp.float32)
    w_hh = jnp.asarray(w_hh, jnp.float32)
    bias = jnp.asarray(b_ih, jnp.float32) + jnp.asarray(b_hh, jnp.float32)

    T, B, I = x.shape
    H = hidden.shape[-1]
    HP = 128 * ((H + 127) // 128)      # lane-aligned per-gate width
    GP = 4 * HP

    # Lane-aligned, pre-transposed, zero-padded weights: gate g occupies column
    # block [g*HP, g*HP+H); padded rows/cols are zero so the padded lanes of
    # h/c remain exactly 0 for the whole recurrence.
    wih_p = jnp.zeros((I, GP), jnp.float32)
    whh_p = jnp.zeros((HP, GP), jnp.float32)
    b_p = jnp.zeros((1, GP), jnp.float32)
    for g in range(4):
        wih_p = wih_p.at[:, g * HP:g * HP + H].set(w_ih[g * H:(g + 1) * H, :].T)
        whh_p = whh_p.at[:H, g * HP:g * HP + H].set(w_hh[g * H:(g + 1) * H, :].T)
        b_p = b_p.at[:, g * HP:g * HP + H].set(bias[g * H:(g + 1) * H])

    h0p = jnp.zeros((B, HP), jnp.float32).at[:, :H].set(hidden[0])
    c0p = jnp.zeros((B, HP), jnp.float32).at[:, :H].set(cell[0])
    x2d = x.reshape(T * B, I)          # sequence-major rows, metadata-only reshape

    def kernel(x_ref, h0_ref, c0_ref, wih_ref, whh_ref, b_ref,
               out_ref, hn_ref, cn_ref, gx_ref):
        # One big MXU pass: input->gate pre-activations for every timestep,
        # bias folded in once (hoisted out of the recurrence).
        gx_ref[...] = (
            jnp.dot(x_ref[...], wih_ref[...], preferred_element_type=jnp.float32)
            + b_ref[...])

        whh = whh_ref[...]                               # loop-invariant

        def step(t, carry):
            h, c = carry                                 # (B, HP) vregs
            row = pl.multiple_of(t * B, B)
            gates = gx_ref[pl.ds(row, B), :] + jnp.dot(
                h, whh, preferred_element_type=jnp.float32)
            # Lane-aligned whole-vreg gate slices (i, f, g, o).
            i_g = jax.nn.sigmoid(gates[:, 0 * HP:1 * HP])
            f_g = jax.nn.sigmoid(gates[:, 1 * HP:2 * HP])
            g_g = jnp.tanh(gates[:, 2 * HP:3 * HP])
            o_g = jax.nn.sigmoid(gates[:, 3 * HP:4 * HP])
            c_new = f_g * c + i_g * g_g
            h_new = o_g * jnp.tanh(c_new)
            out_ref[t] = h_new                           # lane-dense 128-wide store
            return h_new, c_new

        h_n, c_n = lax.fori_loop(0, T, step, (h0_ref[...], c0_ref[...]),
                                 unroll=bool(T <= 32))
        hn_ref[...] = h_n
        cn_ref[...] = c_n

    out_p, hn_p, cn_p = pl.pallas_call(
        kernel,
        grid_spec=pltpu.PrefetchScalarGridSpec(
            num_scalar_prefetch=0,
            grid=(1,),
            in_specs=[
                pl.BlockSpec((T * B, I), lambda i: (0, 0)),      # x (all steps)
                pl.BlockSpec((B, HP), lambda i: (0, 0)),         # h0 (padded)
                pl.BlockSpec((B, HP), lambda i: (0, 0)),         # c0 (padded)
                pl.BlockSpec((I, GP), lambda i: (0, 0)),         # W_ih^T (padded)
                pl.BlockSpec((HP, GP), lambda i: (0, 0)),        # W_hh^T (padded)
                pl.BlockSpec((1, GP), lambda i: (0, 0)),         # bias (padded)
            ],
            out_specs=[
                pl.BlockSpec((T, B, HP), lambda i: (0, 0, 0)),   # output (padded)
                pl.BlockSpec((B, HP), lambda i: (0, 0)),         # h_n (padded)
                pl.BlockSpec((B, HP), lambda i: (0, 0)),         # c_n (padded)
            ],
            scratch_shapes=[
                pltpu.VMEM((T * B, GP), jnp.float32),            # precomputed x-gates
            ],
        ),
        out_shape=(
            jax.ShapeDtypeStruct((T, B, HP), jnp.float32),
            jax.ShapeDtypeStruct((B, HP), jnp.float32),
            jax.ShapeDtypeStruct((B, HP), jnp.float32),
        ),
        compiler_params=pltpu.CompilerParams(
            dimension_semantics=("arbitrary",)),
    )(x2d, h0p, c0p, wih_p, whh_p, b_p)

    out = out_p[:, :, :H]
    h_n = hn_p[None, :, :H]
    c_n = cn_p[None, :, :H]
    return out, h_n, c_n


def _lstm_reference(x, hidden, cell, w_ih, w_hh, b_ih, b_hh):
    """Pure-JAX reference (PyTorch LSTM semantics, gate order i,f,g,o)."""
    H = hidden.shape[-1]
    h0, c0 = hidden[0], cell[0]
    b = b_ih + b_hh

    def step(carry, x_t):
        h, c = carry
        gates = x_t @ w_ih.T + h @ w_hh.T + b
        i = jax.nn.sigmoid(gates[:, 0 * H:1 * H])
        f = jax.nn.sigmoid(gates[:, 1 * H:2 * H])
        g = jnp.tanh(gates[:, 2 * H:3 * H])
        o = jax.nn.sigmoid(gates[:, 3 * H:4 * H])
        c_new = f * c + i * g
        h_new = o * jnp.tanh(c_new)
        return (h_new, c_new), h_new

    (h_n, c_n), ys = lax.scan(step, (h0, c0), x)
    return ys, h_n[None], c_n[None]


if __name__ == "__main__":
    T, B, I, H = 6, 8, 40, 40

    key = jax.random.PRNGKey(0)
    k_x, k_h, k_c, k_wih, k_whh, k_bih, k_bhh = jax.random.split(key, 7)

    # PyTorch nn.LSTM init: U(-1/sqrt(H), 1/sqrt(H))
    bound = 1.0 / jnp.sqrt(jnp.float32(H))
    w_ih = jax.random.uniform(k_wih, (4 * H, I), jnp.float32, -bound, bound)
    w_hh = jax.random.uniform(k_whh, (4 * H, H), jnp.float32, -bound, bound)
    b_ih = jax.random.uniform(k_bih, (4 * H,), jnp.float32, -bound, bound)
    b_hh = jax.random.uniform(k_bhh, (4 * H,), jnp.float32, -bound, bound)

    x = jax.random.normal(k_x, (T, B, I), jnp.float32)
    hidden = jax.random.normal(k_h, (1, B, H), jnp.float32)
    cell = jax.random.normal(k_c, (1, B, H), jnp.float32)

    out, h_n, c_n = lstm_decoder(x, hidden, cell, w_ih, w_hh, b_ih, b_hh)
    jax.block_until_ready((out, h_n, c_n))

    ref_out, ref_h, ref_c = _lstm_reference(x, hidden, cell, w_ih, w_hh, b_ih, b_hh)
    assert jnp.allclose(out, ref_out, atol=1e-5, rtol=1e-5)
    assert jnp.allclose(h_n, ref_h, atol=1e-5, rtol=1e-5)
    assert jnp.allclose(c_n, ref_c, atol=1e-5, rtol=1e-5)

    print("KERNEL_OK")
</pallas_src>

<mosaic_0001>
module attributes {stable_mosaic.version = 11 : i64} {
  func.func @kernel(%arg0: i32, %arg1: memref<48x40xf32, #tpu.memory_space<vmem>>, %arg2: memref<8x128xf32, #tpu.memory_space<vmem>>, %arg3: memref<8x128xf32, #tpu.memory_space<vmem>>, %arg4: memref<40x512xf32, #tpu.memory_space<vmem>>, %arg5: memref<128x512xf32, #tpu.memory_space<vmem>>, %arg6: memref<1x512xf32, #tpu.memory_space<vmem>>, %arg7: memref<6x8x128xf32, #tpu.memory_space<vmem>>, %arg8: memref<8x128xf32, #tpu.memory_space<vmem>>, %arg9: memref<8x128xf32, #tpu.memory_space<vmem>>, %arg10: memref<48x512xf32, #tpu.memory_space<vmem>>) attributes {dimension_semantics = [#tpu.dimension_semantics<arbitrary>], iteration_bounds = array<i64: 1>, scalar_prefetch = 0 : i64, scratch_operands = 1 : i64, tpu.core_type = #tpu.core_type<tc>, window_params = [{pipeline_mode = #tpu.pipeline_mode<synchronous>, transform_indices = @transform_0, window_bounds = array<i64: 48, 40>}, {pipeline_mode = #tpu.pipeline_mode<synchronous>, transform_indices = @transform_1, window_bounds = array<i64: 8, 128>}, {pipeline_mode = #tpu.pipeline_mode<synchronous>, transform_indices = @transform_2, window_bounds = array<i64: 8, 128>}, {pipeline_mode = #tpu.pipeline_mode<synchronous>, transform_indices = @transform_3, window_bounds = array<i64: 40, 512>}, {pipeline_mode = #tpu.pipeline_mode<synchronous>, transform_indices = @transform_4, window_bounds = array<i64: 128, 512>}, {pipeline_mode = #tpu.pipeline_mode<synchronous>, transform_indices = @transform_5, window_bounds = array<i64: 1, 512>}, {pipeline_mode = #tpu.pipeline_mode<synchronous>, transform_indices = @transform_6, window_bounds = array<i64: 6, 8, 128>}, {pipeline_mode = #tpu.pipeline_mode<synchronous>, transform_indices = @transform_7, window_bounds = array<i64: 8, 128>}, {pipeline_mode = #tpu.pipeline_mode<synchronous>, transform_indices = @transform_8, window_bounds = array<i64: 8, 128>}]} {
    %c0 = arith.constant 0 : index
    %c0_0 = arith.constant 0 : index
    %0 = vector.load %arg1[%c0, %c0_0] : memref<48x40xf32, #tpu.memory_space<vmem>>, vector<48x40xf32>
    %c0_1 = arith.constant 0 : index
    %c0_2 = arith.constant 0 : index
    %1 = vector.load %arg4[%c0_1, %c0_2] : memref<40x512xf32, #tpu.memory_space<vmem>>, vector<40x512xf32>
    %cst = arith.constant dense<0.000000e+00> : vector<48x512xf32>
    %2 = tpu.matmul %0, %1, %cst {dimension_numbers = #tpu.dot_dimension_numbers<[1], [0], [0], [1], [0, 0, 1, 1], [], []>} : vector<48x40xf32>, vector<40x512xf32>, vector<48x512xf32> -> vector<48x512xf32>
    %c0_3 = arith.constant 0 : index
    %c0_4 = arith.constant 0 : index
    %3 = vector.load %arg6[%c0_3, %c0_4] : memref<1x512xf32, #tpu.memory_space<vmem>>, vector<1x512xf32>
    %4 = vector.broadcast %3 : vector<1x512xf32> to vector<48x512xf32>
    %5 = arith.addf %2, %4 : vector<48x512xf32>
    %c0_5 = arith.constant 0 : index
    %c0_6 = arith.constant 0 : index
    %6 = vector.load %arg10[%c0_5, %c0_6] : memref<48x512xf32, #tpu.memory_space<vmem>>, vector<48x512xf32>
    tpu.vector_store %arg10[%c0_5, %c0_6], %5 {strides = array<i32>} : memref<48x512xf32, #tpu.memory_space<vmem>>, vector<48x512xf32>,
    %c0_7 = arith.constant 0 : index
    %c0_8 = arith.constant 0 : index
    %7 = vector.load %arg5[%c0_7, %c0_8] : memref<128x512xf32, #tpu.memory_space<vmem>>, vector<128x512xf32>
    %c0_9 = arith.constant 0 : index
    %c0_10 = arith.constant 0 : index
    %8 = vector.load %arg2[%c0_9, %c0_10] : memref<8x128xf32, #tpu.memory_space<vmem>>, vector<8x128xf32>
    %c0_11 = arith.constant 0 : index
    %c0_12 = arith.constant 0 : index
    %9 = vector.load %arg3[%c0_11, %c0_12] : memref<8x128xf32, #tpu.memory_space<vmem>>, vector<8x128xf32>
    %c0_i32 = arith.constant 0 : i32
    %c8_i32 = arith.constant 8 : i32
    %10 = arith.muli %c0_i32, %c8_i32 : i32
    %11 = tpu.assume_multiple %10, 8 : i32
    %12 = arith.index_cast %11 : i32 to index
    %c0_13 = arith.constant 0 : index
    %13 = vector.load %arg10[%12, %c0_13] : memref<48x512xf32, #tpu.memory_space<vmem>>, vector<8x512xf32>
    %cst_14 = arith.constant dense<0.000000e+00> : vector<8x512xf32>
    %14 = tpu.matmul %8, %7, %cst_14 {dimension_numbers = #tpu.dot_dimension_numbers<[1], [0], [0], [1], [0, 0, 1, 1], [], []>} : vector<8x128xf32>, vector<128x512xf32>, vector<8x512xf32> -> vector<8x512xf32>
    %15 = arith.addf %13, %14 : vector<8x512xf32>
    %16 = vector.extract_strided_slice %15 {offsets = [0, 0], sizes = [8, 128], strides = [1, 1]} : vector<8x512xf32> to vector<8x128xf32>
    %17 = arith.negf %16 : vector<8x128xf32>
    %18 = math.exp %17 : vector<8x128xf32>
    %cst_15 = arith.constant 1.000000e+00 : f32
    %19 = vector.broadcast %cst_15 : f32 to vector<8x128xf32>
    %20 = arith.addf %19, %18 : vector<8x128xf32>
    %21 = arith.divf %19, %20 : vector<8x128xf32>
    %22 = vector.extract_strided_slice %15 {offsets = [0, 128], sizes = [8, 128], strides = [1, 1]} : vector<8x512xf32> to vector<8x128xf32>
    %23 = arith.negf %22 : vector<8x128xf32>
    %24 = math.exp %23 : vector<8x128xf32>
    %cst_16 = arith.constant 1.000000e+00 : f32
    %25 = vector.broadcast %cst_16 : f32 to vector<8x128xf32>
    %26 = arith.addf %25, %24 : vector<8x128xf32>
    %27 = arith.divf %25, %26 : vector<8x128xf32>
    %28 = vector.extract_strided_slice %15 {offsets = [0, 256], sizes = [8, 128], strides = [1, 1]} : vector<8x512xf32> to vector<8x128xf32>
    %29 = math.tanh %28 : vector<8x128xf32>
    %30 = vector.extract_strided_slice %15 {offsets = [0, 384], sizes = [8, 128], strides = [1, 1]} : vector<8x512xf32> to vector<8x128xf32>
    %31 = arith.negf %30 : vector<8x128xf32>
    %32 = math.exp %31 : vector<8x128xf32>
    %cst_17 = arith.constant 1.000000e+00 : f32
    %33 = vector.broadcast %cst_17 : f32 to vector<8x128xf32>
    %34 = arith.addf %33, %32 : vector<8x128xf32>
    %35 = arith.divf %33, %34 : vector<8x128xf32>
    %36 = arith.mulf %27, %9 : vector<8x128xf32>
    %37 = arith.mulf %21, %29 : vector<8x128xf32>
    %38 = arith.addf %36, %37 : vector<8x128xf32>
    %39 = math.tanh %38 : vector<8x128xf32>
    %40 = arith.mulf %35, %39 : vector<8x128xf32>
    %41 = arith.index_cast %c0_i32 : i32 to index
    %c0_18 = arith.constant 0 : index
    %c0_19 = arith.constant 0 : index
    %42 = vector.load %arg7[%41, %c0_18, %c0_19] : memref<6x8x128xf32, #tpu.memory_space<vmem>>, vector<1x8x128xf32>
    %43 = vector.shape_cast %42 : vector<1x8x128xf32> to vector<8x128xf32>
    %44 = vector.shape_cast %40 : vector<8x128xf32> to vector<1x8x128xf32>
    tpu.vector_store %arg7[%41, %c0_18, %c0_19], %44 {strides = array<i32>} : memref<6x8x128xf32, #tpu.memory_space<vmem>>, vector<1x8x128xf32>,
    %c1_i32 = arith.constant 1 : i32
    %c8_i32_20 = arith.constant 8 : i32
    %45 = arith.muli %c1_i32, %c8_i32_20 : i32
    %46 = tpu.assume_multiple %45, 8 : i32
    %47 = arith.index_cast %46 : i32 to index
    %c0_21 = arith.constant 0 : index
    %48 = vector.load %arg10[%47, %c0_21] : memref<48x512xf32, #tpu.memory_space<vmem>>, vector<8x512xf32>
    %cst_22 = arith.constant dense<0.000000e+00> : vector<8x512xf32>
    %49 = tpu.matmul %40, %7, %cst_22 {dimension_numbers = #tpu.dot_dimension_numbers<[1], [0], [0], [1], [0, 0, 1, 1], [], []>} : vector<8x128xf32>, vector<128x512xf32>, vector<8x512xf32> -> vector<8x512xf32>
    %50 = arith.addf %48, %49 : vector<8x512xf32>
    %51 = vector.extract_strided_slice %50 {offsets = [0, 0], sizes = [8, 128], strides = [1, 1]} : vector<8x512xf32> to vector<8x128xf32>
    %52 = arith.negf %51 : vector<8x128xf32>
    %53 = math.exp %52 : vector<8x128xf32>
    %cst_23 = arith.constant 1.000000e+00 : f32
    %54 = vector.broadcast %cst_23 : f32 to vector<8x128xf32>
    %55 = arith.addf %54, %53 : vector<8x128xf32>
    %56 = arith.divf %54, %55 : vector<8x128xf32>
    %57 = vector.extract_strided_slice %50 {offsets = [0, 128], sizes = [8, 128], strides = [1, 1]} : vector<8x512xf32> to vector<8x128xf32>
    %58 = arith.negf %57 : vector<8x128xf32>
    %59 = math.exp %58 : vector<8x128xf32>
    %cst_24 = arith.constant 1.000000e+00 : f32
    %60 = vector.broadcast %cst_24 : f32 to vector<8x128xf32>
    %61 = arith.addf %60, %59 : vector<8x128xf32>
    %62 = arith.divf %60, %61 : vector<8x128xf32>
    %63 = vector.extract_strided_slice %50 {offsets = [0, 256], sizes = [8, 128], strides = [1, 1]} : vector<8x512xf32> to vector<8x128xf32>
    %64 = math.tanh %63 : vector<8x128xf32>
    %65 = vector.extract_strided_slice %50 {offsets = [0, 384], sizes = [8, 128], strides = [1, 1]} : vector<8x512xf32> to vector<8x128xf32>
    %66 = arith.negf %65 : vector<8x128xf32>
    %67 = math.exp %66 : vector<8x128xf32>
    %cst_25 = arith.constant 1.000000e+00 : f32
    %68 = vector.broadcast %cst_25 : f32 to vector<8x128xf32>
    %69 = arith.addf %68, %67 : vector<8x128xf32>
    %70 = arith.divf %68, %69 : vector<8x128xf32>
    %71 = arith.mulf %62, %38 : vector<8x128xf32>
    %72 = arith.mulf %56, %64 : vector<8x128xf32>
    %73 = arith.addf %71, %72 : vector<8x128xf32>
    %74 = math.tanh %73 : vector<8x128xf32>
    %75 = arith.mulf %70, %74 : vector<8x128xf32>
    %76 = arith.index_cast %c1_i32 : i32 to index
    %c0_26 = arith.constant 0 : index
    %c0_27 = arith.constant 0 : index
    %77 = vector.load %arg7[%76, %c0_26, %c0_27] : memref<6x8x128xf32, #tpu.memory_space<vmem>>, vector<1x8x128xf32>
    %78 = vector.shape_cast %77 : vector<1x8x128xf32> to vector<8x128xf32>
    %79 = vector.shape_cast %75 : vector<8x128xf32> to vector<1x8x128xf32>
    tpu.vector_store %arg7[%76, %c0_26, %c0_27], %79 {strides = array<i32>} : memref<6x8x128xf32, #tpu.memory_space<vmem>>, vector<1x8x128xf32>,
    %c2_i32 = arith.constant 2 : i32
    %c8_i32_28 = arith.constant 8 : i32
    %80 = arith.muli %c2_i32, %c8_i32_28 : i32
    %81 = tpu.assume_multiple %80, 8 : i32
    %82 = arith.index_cast %81 : i32 to index
    %c0_29 = arith.constant 0 : index
    %83 = vector.load %arg10[%82, %c0_29] : memref<48x512xf32, #tpu.memory_space<vmem>>, vector<8x512xf32>
    %cst_30 = arith.constant dense<0.000000e+00> : vector<8x512xf32>
    %84 = tpu.matmul %75, %7, %cst_30 {dimension_numbers = #tpu.dot_dimension_numbers<[1], [0], [0], [1], [0, 0, 1, 1], [], []>} : vector<8x128xf32>, vector<128x512xf32>, vector<8x512xf32> -> vector<8x512xf32>
    %85 = arith.addf %83, %84 : vector<8x512xf32>
    %86 = vector.extract_strided_slice %85 {offsets = [0, 0], sizes = [8, 128], strides = [1, 1]} : vector<8x512xf32> to vector<8x128xf32>
    %87 = arith.negf %86 : vector<8x128xf32>
    %88 = math.exp %87 : vector<8x128xf32>
    %cst_31 = arith.constant 1.000000e+00 : f32
    %89 = vector.broadcast %cst_31 : f32 to vector<8x128xf32>
    %90 = arith.addf %89, %88 : vector<8x128xf32>
    %91 = arith.divf %89, %90 : vector<8x128xf32>
    %92 = vector.extract_strided_slice %85 {offsets = [0, 128], sizes = [8, 128], strides = [1, 1]} : vector<8x512xf32> to vector<8x128xf32>
    %93 = arith.negf %92 : vector<8x128xf32>
    %94 = math.exp %93 : vector<8x128xf32>
    %cst_32 = arith.constant 1.000000e+00 : f32
    %95 = vector.broadcast %cst_32 : f32 to vector<8x128xf32>
    %96 = arith.addf %95, %94 : vector<8x128xf32>
    %97 = arith.divf %95, %96 : vector<8x128xf32>
    %98 = vector.extract_strided_slice %85 {offsets = [0, 256], sizes = [8, 128], strides = [1, 1]} : vector<8x512xf32> to vector<8x128xf32>
    %99 = math.tanh %98 : vector<8x128xf32>
    %100 = vector.extract_strided_slice %85 {offsets = [0, 384], sizes = [8, 128], strides = [1, 1]} : vector<8x512xf32> to vector<8x128xf32>
    %101 = arith.negf %100 : vector<8x128xf32>
    %102 = math.exp %101 : vector<8x128xf32>
    %cst_33 = arith.constant 1.000000e+00 : f32
    %103 = vector.broadcast %cst_33 : f32 to vector<8x128xf32>
    %104 = arith.addf %103, %102 : vector<8x128xf32>
    %105 = arith.divf %103, %104 : vector<8x128xf32>
    %106 = arith.mulf %97, %73 : vector<8x128xf32>
    %107 = arith.mulf %91, %99 : vector<8x128xf32>
    %108 = arith.addf %106, %107 : vector<8x128xf32>
    %109 = math.tanh %108 : vector<8x128xf32>
    %110 = arith.mulf %105, %109 : vector<8x128xf32>
    %111 = arith.index_cast %c2_i32 : i32 to index
    %c0_34 = arith.constant 0 : index
    %c0_35 = arith.constant 0 : index
    %112 = vector.load %arg7[%111, %c0_34, %c0_35] : memref<6x8x128xf32, #tpu.memory_space<vmem>>, vector<1x8x128xf32>
    %113 = vector.shape_cast %112 : vector<1x8x128xf32> to vector<8x128xf32>
    %114 = vector.shape_cast %110 : vector<8x128xf32> to vector<1x8x128xf32>
    tpu.vector_store %arg7[%111, %c0_34, %c0_35], %114 {strides = array<i32>} : memref<6x8x128xf32, #tpu.memory_space<vmem>>, vector<1x8x128xf32>,
    %c3_i32 = arith.constant 3 : i32
    %c8_i32_36 = arith.constant 8 : i32
    %115 = arith.muli %c3_i32, %c8_i32_36 : i32
    %116 = tpu.assume_multiple %115, 8 : i32
    %117 = arith.index_cast %116 : i32 to index
    %c0_37 = arith.constant 0 : index
    %118 = vector.load %arg10[%117, %c0_37] : memref<48x512xf32, #tpu.memory_space<vmem>>, vector<8x512xf32>
    %cst_38 = arith.constant dense<0.000000e+00> : vector<8x512xf32>
    %119 = tpu.matmul %110, %7, %cst_38 {dimension_numbers = #tpu.dot_dimension_numbers<[1], [0], [0], [1], [0, 0, 1, 1], [], []>} : vector<8x128xf32>, vector<128x512xf32>, vector<8x512xf32> -> vector<8x512xf32>
    %120 = arith.addf %118, %119 : vector<8x512xf32>
    %121 = vector.extract_strided_slice %120 {offsets = [0, 0], sizes = [8, 128], strides = [1, 1]} : vector<8x512xf32> to vector<8x128xf32>
    %122 = arith.negf %121 : vector<8x128xf32>
    %123 = math.exp %122 : vector<8x128xf32>
    %cst_39 = arith.constant 1.000000e+00 : f32
    %124 = vector.broadcast %cst_39 : f32 to vector<8x128xf32>
    %125 = arith.addf %124, %123 : vector<8x128xf32>
    %126 = arith.divf %124, %125 : vector<8x128xf32>
    %127 = vector.extract_strided_slice %120 {offsets = [0, 128], sizes = [8, 128], strides = [1, 1]} : vector<8x512xf32> to vector<8x128xf32>
    %128 = arith.negf %127 : vector<8x128xf32>
    %129 = math.exp %128 : vector<8x128xf32>
    %cst_40 = arith.constant 1.000000e+00 : f32
    %130 = vector.broadcast %cst_40 : f32 to vector<8x128xf32>
    %131 = arith.addf %130, %129 : vector<8x128xf32>
    %132 = arith.divf %130, %131 : vector<8x128xf32>
    %133 = vector.extract_strided_slice %120 {offsets = [0, 256], sizes = [8, 128], strides = [1, 1]} : vector<8x512xf32> to vector<8x128xf32>
    %134 = math.tanh %133 : vector<8x128xf32>
    %135 = vector.extract_strided_slice %120 {offsets = [0, 384], sizes = [8, 128], strides = [1, 1]} : vector<8x512xf32> to vector<8x128xf32>
    %136 = arith.negf %135 : vector<8x128xf32>
    %137 = math.exp %136 : vector<8x128xf32>
    %cst_41 = arith.constant 1.000000e+00 : f32
    %138 = vector.broadcast %cst_41 : f32 to vector<8x128xf32>
    %139 = arith.addf %138, %137 : vector<8x128xf32>
    %140 = arith.divf %138, %139 : vector<8x128xf32>
    %141 = arith.mulf %132, %108 : vector<8x128xf32>
    %142 = arith.mulf %126, %134 : vector<8x128xf32>
    %143 = arith.addf %141, %142 : vector<8x128xf32>
    %144 = math.tanh %143 : vector<8x128xf32>
    %145 = arith.mulf %140, %144 : vector<8x128xf32>
    %146 = arith.index_cast %c3_i32 : i32 to index
    %c0_42 = arith.constant 0 : index
    %c0_43 = arith.constant 0 : index
    %147 = vector.load %arg7[%146, %c0_42, %c0_43] : memref<6x8x128xf32, #tpu.memory_space<vmem>>, vector<1x8x128xf32>
    %148 = vector.shape_cast %147 : vector<1x8x128xf32> to vector<8x128xf32>
    %149 = vector.shape_cast %145 : vector<8x128xf32> to vector<1x8x128xf32>
    tpu.vector_store %arg7[%146, %c0_42, %c0_43], %149 {strides = array<i32>} : memref<6x8x128xf32, #tpu.memory_space<vmem>>, vector<1x8x128xf32>,
    %c4_i32 = arith.constant 4 : i32
    %c8_i32_44 = arith.constant 8 : i32
    %150 = arith.muli %c4_i32, %c8_i32_44 : i32
    %151 = tpu.assume_multiple %150, 8 : i32
    %152 = arith.index_cast %151 : i32 to index
    %c0_45 = arith.constant 0 : index
    %153 = vector.load %arg10[%152, %c0_45] : memref<48x512xf32, #tpu.memory_space<vmem>>, vector<8x512xf32>
    %cst_46 = arith.constant dense<0.000000e+00> : vector<8x512xf32>
    %154 = tpu.matmul %145, %7, %cst_46 {dimension_numbers = #tpu.dot_dimension_numbers<[1], [0], [0], [1], [0, 0, 1, 1], [], []>} : vector<8x128xf32>, vector<128x512xf32>, vector<8x512xf32> -> vector<8x512xf32>
    %155 = arith.addf %153, %154 : vector<8x512xf32>
    %156 = vector.extract_strided_slice %155 {offsets = [0, 0], sizes = [8, 128], strides = [1, 1]} : vector<8x512xf32> to vector<8x128xf32>
    %157 = arith.negf %156 : vector<8x128xf32>
    %158 = math.exp %157 : vector<8x128xf32>
    %cst_47 = arith.constant 1.000000e+00 : f32
    %159 = vector.broadcast %cst_47 : f32 to vector<8x128xf32>
    %160 = arith.addf %159, %158 : vector<8x128xf32>
    %161 = arith.divf %159, %160 : vector<8x128xf32>
    %162 = vector.extract_strided_slice %155 {offsets = [0, 128], sizes = [8, 128], strides = [1, 1]} : vector<8x512xf32> to vector<8x128xf32>
    %163 = arith.negf %162 : vector<8x128xf32>
    %164 = math.exp %163 : vector<8x128xf32>
    %cst_48 = arith.constant 1.000000e+00 : f32
    %165 = vector.broadcast %cst_48 : f32 to vector<8x128xf32>
    %166 = arith.addf %165, %164 : vector<8x128xf32>
    %167 = arith.divf %165, %166 : vector<8x128xf32>
    %168 = vector.extract_strided_slice %155 {offsets = [0, 256], sizes = [8, 128], strides = [1, 1]} : vector<8x512xf32> to vector<8x128xf32>
    %169 = math.tanh %168 : vector<8x128xf32>
    %170 = vector.extract_strided_slice %155 {offsets = [0, 384], sizes = [8, 128], strides = [1, 1]} : vector<8x512xf32> to vector<8x128xf32>
    %171 = arith.negf %170 : vector<8x128xf32>
    %172 = math.exp %171 : vector<8x128xf32>
    %cst_49 = arith.constant 1.000000e+00 : f32
    %173 = vector.broadcast %cst_49 : f32 to vector<8x128xf32>
    %174 = arith.addf %173, %172 : vector<8x128xf32>
    %175 = arith.divf %173, %174 : vector<8x128xf32>
    %176 = arith.mulf %167, %143 : vector<8x128xf32>
    %177 = arith.mulf %161, %169 : vector<8x128xf32>
    %178 = arith.addf %176, %177 : vector<8x128xf32>
    %179 = math.tanh %178 : vector<8x128xf32>
    %180 = arith.mulf %175, %179 : vector<8x128xf32>
    %181 = arith.index_cast %c4_i32 : i32 to index
    %c0_50 = arith.constant 0 : index
    %c0_51 = arith.constant 0 : index
    %182 = vector.load %arg7[%181, %c0_50, %c0_51] : memref<6x8x128xf32, #tpu.memory_space<vmem>>, vector<1x8x128xf32>
    %183 = vector.shape_cast %182 : vector<1x8x128xf32> to vector<8x128xf32>
    %184 = vector.shape_cast %180 : vector<8x128xf32> to vector<1x8x128xf32>
    tpu.vector_store %arg7[%181, %c0_50, %c0_51], %184 {strides = array<i32>} : memref<6x8x128xf32, #tpu.memory_space<vmem>>, vector<1x8x128xf32>,
    %c5_i32 = arith.constant 5 : i32
    %c8_i32_52 = arith.constant 8 : i32
    %185 = arith.muli %c5_i32, %c8_i32_52 : i32
    %186 = tpu.assume_multiple %185, 8 : i32
    %187 = arith.index_cast %186 : i32 to index
    %c0_53 = arith.constant 0 : index
    %188 = vector.load %arg10[%187, %c0_53] : memref<48x512xf32, #tpu.memory_space<vmem>>, vector<8x512xf32>
    %cst_54 = arith.constant dense<0.000000e+00> : vector<8x512xf32>
    %189 = tpu.matmul %180, %7, %cst_54 {dimension_numbers = #tpu.dot_dimension_numbers<[1], [0], [0], [1], [0, 0, 1, 1], [], []>} : vector<8x128xf32>, vector<128x512xf32>, vector<8x512xf32> -> vector<8x512xf32>
    %190 = arith.addf %188, %189 : vector<8x512xf32>
    %191 = vector.extract_strided_slice %190 {offsets = [0, 0], sizes = [8, 128], strides = [1, 1]} : vector<8x512xf32> to vector<8x128xf32>
    %192 = arith.negf %191 : vector<8x128xf32>
    %193 = math.exp %192 : vector<8x128xf32>
    %cst_55 = arith.constant 1.000000e+00 : f32
    %194 = vector.broadcast %cst_55 : f32 to vector<8x128xf32>
    %195 = arith.addf %194, %193 : vector<8x128xf32>
    %196 = arith.divf %194, %195 : vector<8x128xf32>
    %197 = vector.extract_strided_slice %190 {offsets = [0, 128], sizes = [8, 128], strides = [1, 1]} : vector<8x512xf32> to vector<8x128xf32>
    %198 = arith.negf %197 : vector<8x128xf32>
    %199 = math.exp %198 : vector<8x128xf32>
    %cst_56 = arith.constant 1.000000e+00 : f32
    %200 = vector.broadcast %cst_56 : f32 to vector<8x128xf32>
    %201 = arith.addf %200, %199 : vector<8x128xf32>
    %202 = arith.divf %200, %201 : vector<8x128xf32>
    %203 = vector.extract_strided_slice %190 {offsets = [0, 256], sizes = [8, 128], strides = [1, 1]} : vector<8x512xf32> to vector<8x128xf32>
    %204 = math.tanh %203 : vector<8x128xf32>
    %205 = vector.extract_strided_slice %190 {offsets = [0, 384], sizes = [8, 128], strides = [1, 1]} : vector<8x512xf32> to vector<8x128xf32>
    %206 = arith.negf %205 : vector<8x128xf32>
    %207 = math.exp %206 : vector<8x128xf32>
    %cst_57 = arith.constant 1.000000e+00 : f32
    %208 = vector.broadcast %cst_57 : f32 to vector<8x128xf32>
    %209 = arith.addf %208, %207 : vector<8x128xf32>
    %210 = arith.divf %208, %209 : vector<8x128xf32>
    %211 = arith.mulf %202, %178 : vector<8x128xf32>
    %212 = arith.mulf %196, %204 : vector<8x128xf32>
    %213 = arith.addf %211, %212 : vector<8x128xf32>
    %214 = math.tanh %213 : vector<8x128xf32>
    %215 = arith.mulf %210, %214 : vector<8x128xf32>
    %216 = arith.index_cast %c5_i32 : i32 to index
    %c0_58 = arith.constant 0 : index
    %c0_59 = arith.constant 0 : index
    %217 = vector.load %arg7[%216, %c0_58, %c0_59] : memref<6x8x128xf32, #tpu.memory_space<vmem>>, vector<1x8x128xf32>
    %218 = vector.shape_cast %217 : vector<1x8x128xf32> to vector<8x128xf32>
    %219 = vector.shape_cast %215 : vector<8x128xf32> to vector<1x8x128xf32>
    tpu.vector_store %arg7[%216, %c0_58, %c0_59], %219 {strides = array<i32>} : memref<6x8x128xf32, #tpu.memory_space<vmem>>, vector<1x8x128xf32>,
    %c6_i32 = arith.constant 6 : i32
    %c0_60 = arith.constant 0 : index
    %c0_61 = arith.constant 0 : index
    %220 = vector.load %arg8[%c0_60, %c0_61] : memref<8x128xf32, #tpu.memory_space<vmem>>, vector<8x128xf32>
    tpu.vector_store %arg8[%c0_60, %c0_61], %215 {strides = array<i32>} : memref<8x128xf32, #tpu.memory_space<vmem>>, vector<8x128xf32>,
    %c0_62 = arith.constant 0 : index
    %c0_63 = arith.constant 0 : index
    %221 = vector.load %arg9[%c0_62, %c0_63] : memref<8x128xf32, #tpu.memory_space<vmem>>, vector<8x128xf32>
    tpu.vector_store %arg9[%c0_62, %c0_63], %213 {strides = array<i32>} : memref<8x128xf32, #tpu.memory_space<vmem>>, vector<8x128xf32>,
    return
  }
  func.func @transform_0(%arg0: i32) -> (i32, i32) {
    %c0_i32 = arith.constant 0 : i32
    %c0_i32_0 = arith.constant 0 : i32
    %c0_i32_1 = arith.constant 0 : i32
    return %c0_i32, %c0_i32_0 : i32, i32
  }
  func.func @transform_1(%arg0: i32) -> (i32, i32) {
    %c0_i32 = arith.constant 0 : i32
    %c0_i32_0 = arith.constant 0 : i32
    %c0_i32_1 = arith.constant 0 : i32
    return %c0_i32, %c0_i32_0 : i32, i32
  }
  func.func @transform_2(%arg0: i32) -> (i32, i32) {
    %c0_i32 = arith.constant 0 : i32
    %c0_i32_0 = arith.constant 0 : i32
    %c0_i32_1 = arith.constant 0 : i32
    return %c0_i32, %c0_i32_0 : i32, i32
  }
  func.func @transform_3(%arg0: i32) -> (i32, i32) {
    %c0_i32 = arith.constant 0 : i32
    %c0_i32_0 = arith.constant 0 : i32
    %c0_i32_1 = arith.constant 0 : i32
    return %c0_i32, %c0_i32_0 : i32, i32
  }
  func.func @transform_4(%arg0: i32) -> (i32, i32) {
    %c0_i32 = arith.constant 0 : i32
    %c0_i32_0 = arith.constant 0 : i32
    %c0_i32_1 = arith.constant 0 : i32
    return %c0_i32, %c0_i32_0 : i32, i32
  }
  func.func @transform_5(%arg0: i32) -> (i32, i32) {
    %c0_i32 = arith.constant 0 : i32
    %c0_i32_0 = arith.constant 0 : i32
    %c0_i32_1 = arith.constant 0 : i32
    return %c0_i32, %c0_i32_0 : i32, i32
  }
  func.func @transform_6(%arg0: i32) -> (i32, i32, i32) {
    %c0_i32 = arith.constant 0 : i32
    %c0_i32_0 = arith.constant 0 : i32
    %c0_i32_1 = arith.constant 0 : i32
    %c0_i32_2 = arith.constant 0 : i32
    return %c0_i32, %c0_i32_0, %c0_i32_1 : i32, i32, i32
  }
  func.func @transform_7(%arg0: i32) -> (i32, i32) {
    %c0_i32 = arith.constant 0 : i32
    %c0_i32_0 = arith.constant 0 : i32
    %c0_i32_1 = arith.constant 0 : i32
    return %c0_i32, %c0_i32_0 : i32, i32
  }
  func.func @transform_8(%arg0: i32) -> (i32, i32) {
    %c0_i32 = arith.constant 0 : i32
    %c0_i32_0 = arith.constant 0 : i32
    %c0_i32_1 = arith.constant 0 : i32
    return %c0_i32, %c0_i32_0 : i32, i32
  }
}

</mosaic_0001>

<bundles_post_ra>
// kernel: tpu_custom_call.1
= control target key start
LH: loop header
LB: loop body
LE: loop exit
PB: predicated region body
PF: predicated region fallthrough
CT: control target
= control target key end

     0   :  { %14 = vsyncpa [#allocation4], 0  ;;  %s2738_s0 = inlined_call_operand.vmem [shape: f32[48,40], index: 0, kind: input, shape index: {}]   ;;  %s2739_s1 = inlined_call_operand.vmem [shape: f32[8,128], index: 1, kind: input, shape index: {}]   ;;  %s2740_s2 = inlined_call_operand.vmem [shape: f32[8,128], index: 2, kind: input, shape index: {}]   ;;  %s2741_s3 = inlined_call_operand.hbm [shape: f32[40,512], index: 3, kind: input, shape index: {}]   ;;  %s2742_s4 = inlined_call_operand.hbm [shape: f32[128,512], index: 4, kind: input, shape index: {}]   ;;  %s2743_s5 = inlined_call_operand.vmem [shape: f32[1,512], index: 5, kind: input, shape index: {}]   ;;  %s2744_s6 = inlined_call_operand.hbm [shape: f32[6,8,128], index: 6, kind: output, shape index: {0}]   ;;  %s2745_s7 = inlined_call_operand.hbm [shape: f32[8,128], index: 7, kind: output, shape index: {1}]   ;;  %s2746_s8 = inlined_call_operand.hbm [shape: f32[8,128], index: 8, kind: output, shape index: {2}]  }
   0x1   :  { %15 = vsyncpa [#allocation7], 0 }
   0x2   :  { %16 = vsyncpa [#allocation5], 0 }
   0x3   :  { %17 = vsyncpa [#allocation10], 0  ;;  %s2242_s27 = smov [#allocation3]   ;;  %s2124_s9 = scalar_lea.hbm %s2741_s3, 2560 }
   0x4   :  { %s29_s28 = sshll.u32 %s2242_s27, 4  ;;  %p2125_p0 = scmp.ne.s32.totalorder %s2741_s3, %s2124_s9  ;;  %s30_s28 = int_to_ptr.vmem [resolvable:$true] %s29_s28 }
   0x5   :  { %p2128_p1 = scmp.lt.u32.totalorder %s2124_s9, %s2741_s3 }
   0x7   :  { %p2130_p2 = pnand %p2128_p1, %p2125_p0 }
   0x9   :  { %2133 = shalt.err (!%p2130_p2)
}
   0xa   :  { %s2134_s14 = scalar_lea.vmem %s30_s28, 2560  ;;  %p2139_p4 = scmp.lt.s32.totalorder %s30_s28, %s30_s28 }
   0xb   :  { %p2135_p3 = scmp.ne.s32.totalorder %s30_s28, %s2134_s14  ;;  %p2140_p5 = scmp.lt.s32.totalorder %s2134_s14, %s2134_s14 }
   0xd   :  { %p2141_p6 = por %p2140_p5, %p2139_p4 }
   0xf   :  { %p2142_p7 = pnand %p2141_p6, %p2135_p3 }
  0x11   :  { %2145 = shalt.err (!%p2142_p7)
}
  0x12   :  { %s2243_s15 = smov 512   ;;  %s2244_s16 = smov 32  }
  0x13   :  { %35 = dma.hbm_to_vmem [thread:$0]  %s2741_s3, 2560, %s30_s28, [#allocation4], %s2243_s15, %s2243_s15, %s2244_s16  }
  0x14   :  { %s2245_s19 = smov [#allocation6]   ;;  %s2146_s23 = scalar_lea.hbm %s2742_s4, 8192 }
  0x15   :  { %s41_s20 = sshll.u32 %s2245_s19, 4  ;;  %p2147_p8 = scmp.ne.s32.totalorder %s2742_s4, %s2146_s23  ;;  %s42_s20 = int_to_ptr.vmem [resolvable:$true] %s41_s20 }
  0x16   :  { %p2150_p9 = scmp.lt.u32.totalorder %s2146_s23, %s2742_s4 }
  0x18   :  { %p2152_p10 = pnand %p2150_p9, %p2147_p8 }
  0x1a   :  { %2155 = shalt.err (!%p2152_p10)
}
  0x1b   :  { %s2156_s29 = scalar_lea.vmem %s42_s20, 8192  ;;  %p2161_p12 = scmp.lt.s32.totalorder %s42_s20, %s42_s20 }
  0x1c   :  { %p2157_p11 = scmp.ne.s32.totalorder %s42_s20, %s2156_s29  ;;  %p2162_p13 = scmp.lt.s32.totalorder %s2156_s29, %s2156_s29 }
  0x1e   :  { %p2163_p0 = por %p2162_p13, %p2161_p12 }
  0x20   :  { %p2164_p1 = pnand %p2163_p0, %p2157_p11 }
  0x22   :  { %2167 = shalt.err (!%p2164_p1)
}
  0x23   :  { %47 = dma.hbm_to_vmem [thread:$0]  %s2742_s4, 8192, %s42_s20, [#allocation7], %s2243_s15, %s2243_s15, %s2244_s16  }
  0x24   :  { %2234 = dma.done.wait [#allocation4], 2560  }
  0x25   :  { %2235 = vsyncadd [#allocation4], 4294964736 }
  0x26   :  { %2236 = dma.done.wait [#allocation7], 8192  }
  0x27   :  { %2237 = vsyncadd [#allocation7], 4294959104  ;;  %v2246_v0 = vmov 0.0   ;;  %v63_v1 = vld [vmem:[#allocation3 + $0x8] sm:$0xff]  ;;  %v65_v3 = vld [vmem:[#allocation3 + $0x18] sm:$0xff]  ;;  %vm104_vm0 = vcmask 326656  }
  0x28   :  { %187 = vmatprep.mubr.f32.mxu0 %v2246_v0  ;;  %288 = vmatprep.mubr.f32.mxu1 %v2246_v0  ;;  %v67_v2 = vld [vmem:[#allocation3 + $0x28] sm:$0xff]  ;;  %v69_v5 = vld [vmem:[#allocation3 + $0x38] sm:$0xff]  ;;  %v62_v6 = vld [vmem:[#allocation3] sm:$0xff]  ;;  %s2248_s23 = smov [#allocation8]   ;;  %s2249_s25 = smov [#allocation11]  }
  0x29   :  { %v1570_v4 = vpack.c.bf16 %v67_v2, %v63_v1  ;;  %v66_v7 = vld [vmem:[#allocation3 + $0x20] sm:$0xff]  ;;  %v1578_v8 = vpack.c.bf16 %v69_v5, %v65_v3  ;;  %v64_v10 = vld [vmem:[#allocation3 + $0x10] sm:$0xff]  ;;  %v71_v12 = vld [vmem:[#allocation3 + $0x48] sm:$0xff]  ;;  %s1495_s24 = sshll.u32 %s2248_s23, 4  ;;  %s1518_s26 = sshll.u32 %s2249_s25, 4  ;;  %s2688_s24 = int_to_ptr.vmem [resolvable:$true] %s1495_s24  ;;  %s2690_s26 = int_to_ptr.vmem [resolvable:$true] %s1518_s26 }
  0x2a   :  { %v1572_v9 = vpack.c.bf16 %v66_v7, %v62_v6  ;;  %v68_v11 = vld [vmem:[#allocation3 + $0x30] sm:$0xff]  ;;  %v75_v14 = vld [vmem:[#allocation3 + $0x68] sm:$0xff]  ;;  %v73_v15 = vld [vmem:[#allocation3 + $0x58] sm:$0xff] }
  0x2b   :  { %1571 = vmatprep.subr.bf16.mxu0 %v1570_v4  ;;  %v1580_v13 = vpack.c.bf16 %v68_v11, %v64_v10  ;;  %v77_v16 = vld [vmem:[#allocation3 + $0x78] sm:$0xff]  ;;  %1579 = vmatprep.subr.bf16.mxu1 %v1578_v8  ;;  %v1574_v17 = vpack.c.bf16 %v75_v14, %v71_v12  ;;  %v70_v19 = vld [vmem:[#allocation3 + $0x40] sm:$0xff]  ;;  %v72_v21 = vld [vmem:[#allocation3 + $0x50] sm:$0xff] }
  0x2c   :  { %1573 = vmatpush1.bf16.msra.mxu0 %v1572_v9  ;;  %v1582_v18 = vpack.c.bf16 %v77_v16, %v73_v15  ;;  %v74_v20 = vld [vmem:[#allocation3 + $0x60] sm:$0xff]  ;;  %v76_v23 = vld [vmem:[#allocation3 + $0x70] sm:$0xff]  ;;  %v79_v25 = vld [vmem:[#allocation3 + $0x88] sm:$0xff] }
  0x2d   :  { %1581 = vmatpush1.bf16.msra.mxu1 %v1580_v13  ;;  %v1576_v22 = vpack.c.bf16 %v74_v20, %v70_v19  ;;  %1575 = vmatprep.subr.bf16.mxu0 %v1574_v17  ;;  %v1584_v24 = vpack.c.bf16 %v76_v23, %v72_v21  ;;  %v81_v26 = vld [vmem:[#allocation3 + $0x98] sm:$0xff]  ;;  %v350_v27 = vld [vmem:[#allocation6 + $0x8] sm:$0xff]  ;;  %v78_v28 = vld [vmem:[#allocation3 + $0x80] sm:$0xff] }
  0x2e   :  { %1583 = vmatprep.subr.bf16.mxu1 %v1582_v18  ;;  %v354_v29 = vld [vmem:[#allocation6 + $0x28] sm:$0xff]  ;;  %v352_v30 = vld [vmem:[#allocation6 + $0x18] sm:$0xff]  ;;  %v80_v32 = vld [vmem:[#allocation3 + $0x90] sm:$0xff] }
  0x2f   :  { %v356_v31 = vld [vmem:[#allocation6 + $0x38] sm:$0xff]  ;;  %v349_v33 = vld [vmem:[#allocation6] sm:$0xff]  ;;  %v2323_v35 = vpack.c.bf16 %v354_v29, %v350_v27  ;;  %v351_v36 = vld [vmem:[#allocation6 + $0x10] sm:$0xff] }
  0x30   :  { %1577 = vmatpush1.bf16.msra.mxu0 %v1576_v22  ;;  %v353_v34 = vld [vmem:[#allocation6 + $0x20] sm:$0xff]  ;;  %v355_v37 = vld [vmem:[#allocation6 + $0x30] sm:$0xff]  ;;  %v358_v38 = vld [vmem:[#allocation6 + $0x48] sm:$0xff]  ;;  %v2325_v39 = vpack.c.bf16 %v356_v31, %v352_v30 }
  0x31   :  { %1585 = vmatpush1.bf16.msra.mxu1 %v1584_v24  ;;  %131 = vmatprep.subr.mxu0 %v79_v25  ;;  %v362_v40 = vld [vmem:[#allocation6 + $0x68] sm:$0xff]  ;;  %v360_v41 = vld [vmem:[#allocation6 + $0x58] sm:$0xff]  ;;  %v56_v43 = vld [vmem:[%s2738_s0] sm:$0xff]  ;;  %v2330_v44 = vpack.c.bf16 %v353_v34, %v349_v33  ;;  %v2332_v45 = vpack.c.bf16 %v355_v37, %v351_v36 }
  0x32   :  { %232 = vmatprep.subr.mxu1 %v81_v26  ;;  %v364_v42 = vld [vmem:[#allocation6 + $0x78] sm:$0xff]  ;;  %v2334_v46 = vpack.c.bf16 %v362_v40, %v358_v38  ;;  %v357_v47 = vld [vmem:[#allocation6 + $0x40] sm:$0xff]  ;;  %v359_v49 = vld [vmem:[#allocation6 + $0x50] sm:$0xff] }
  0x33   :  { %v361_v48 = vld [vmem:[#allocation6 + $0x60] sm:$0xff]  ;;  %v2337_v50 = vpack.c.bf16 %v364_v42, %v360_v41  ;;  %v363_v51 = vld [vmem:[#allocation6 + $0x70] sm:$0xff]  ;;  %v366_v52 = vld [vmem:[#allocation6 + $0x88] sm:$0xff] }
  0x34   :  { %132 = vmatpush1.msra.mxu0 %v78_v28  ;;  %v370_v53 = vld [vmem:[#allocation6 + $0xa8] sm:$0xff]  ;;  %v368_v54 = vld [vmem:[#allocation6 + $0x98] sm:$0xff]  ;;  %v2343_v56 = vpack.c.bf16 %v361_v48, %v357_v47  ;;  %v2350_v58 = vpack.c.bf16 %v363_v51, %v359_v49  ;;  %v365_v60 = vld [vmem:[#allocation6 + $0x80] sm:$0xff] }
  0x35   :  { %233 = vmatpush1.msra.mxu1 %v80_v32  ;;  %1587 = vmatprep.subr.bf16.mxu0 %v2323_v35  ;;  %v372_v55 = vld [vmem:[#allocation6 + $0xb8] sm:$0xff]  ;;  %v57_v57 = vld [vmem:[%s2738_s0 + $0x8] sm:$0xff]  ;;  %v2352_v59 = vpack.c.bf16 %v370_v53, %v366_v52  ;;  %v369_v61 = vld [vmem:[#allocation6 + $0xa0] sm:$0xff] }
  0x36   :  { %1619 = vmatprep.subr.bf16.mxu1 %v2325_v39  ;;  %1540 = vmatmul.mubr.msk.f32.vlgmr.msra.gmra.mrb[0].mxu0 %vm104_vm0, %v56_v43  ;;  %v367_v62 = vld [vmem:[#allocation6 + $0x90] sm:$0xff]  ;;  %v2355_v63 = vpack.c.bf16 %v372_v55, %v368_v54  ;;  %v374_v2 = vld [vmem:[#allocation6 + $0xc8] sm:$0xff]  ;;  %v376_v4 = vld [vmem:[#allocation6 + $0xd8] sm:$0xff]  ;;  %v2361_v6 = vpack.c.bf16 %v369_v61, %v365_v60 }
  0x37   :  { %1546 = vmatmul.mubr.msk.f32.vlgmr.msra.gmra.mrb[0].mxu1 %vm104_vm0, %v56_v43  ;;  %1589 = vmatpush1.bf16.msra.mxu0 %v2330_v44  ;;  %v371_v1 = vld [vmem:[#allocation6 + $0xb0] sm:$0xff]  ;;  %v378_v3 = vld [vmem:[#allocation6 + $0xe8] sm:$0xff]  ;;  %v380_v5 = vld [vmem:[#allocation6 + $0xf8] sm:$0xff] }
  0x38   :  { %1621 = vmatpush1.bf16.msra.mxu1 %v2332_v45  ;;  %1591 = vmatprep.subr.bf16.mxu0 %v2334_v46  ;;  %v58_v7 = vld [vmem:[%s2738_s0 + $0x10] sm:$0xff]  ;;  %v2369_v8 = vpack.c.bf16 %v371_v1, %v367_v62  ;;  %v2371_v9 = vpack.c.bf16 %v378_v3, %v374_v2  ;;  %v373_v10 = vld [vmem:[#allocation6 + $0xc0] sm:$0xff]  ;;  %v2374_v13 = vpack.c.bf16 %v380_v5, %v376_v4  ;;  %v382_v15 = vld [vmem:[#allocation6 + $0x108] sm:$0xff] }
  0x39   :  { %1623 = vmatprep.subr.bf16.mxu1 %v2337_v50  ;;  %193 = vmatprep.mubr.f32.mxu0 %v2246_v0  ;;  %v377_v11 = vld [vmem:[#allocation6 + $0xe0] sm:$0xff]  ;;  %v375_v12 = vld [vmem:[#allocation6 + $0xd0] sm:$0xff]  ;;  %v386_v16 = vld [vmem:[#allocation6 + $0x128] sm:$0xff] }
  0x3a   :  { %294 = vmatprep.mubr.f32.mxu1 %v2246_v0  ;;  %1541 = vmatmul.mubr.msk.f32.gmra.mrb[2].mxu0 %vm104_vm0, %v57_v57  ;;  %v379_v14 = vld [vmem:[#allocation6 + $0xf0] sm:$0xff]  ;;  %v384_v17 = vld [vmem:[#allocation6 + $0x118] sm:$0xff]  ;;  %v2380_v19 = vpack.c.bf16 %v377_v11, %v373_v10  ;;  %v2390_v22 = vpack.c.bf16 %v386_v16, %v382_v15  ;;  %v381_v23 = vld [vmem:[#allocation6 + $0x100] sm:$0xff] }
  0x3b   :  { %1593 = vmatpush1.bf16.msra.mxu0 %v2343_v56  ;;  %1547 = vmatmul.mubr.msk.f32.gmra.mrb[2].mxu1 %vm104_vm0, %v57_v57  ;;  %v388_v18 = vld [vmem:[#allocation6 + $0x138] sm:$0xff]  ;;  %v2388_v21 = vpack.c.bf16 %v379_v14, %v375_v12  ;;  %v385_v24 = vld [vmem:[#allocation6 + $0x120] sm:$0xff]  ;;  %v383_v25 = vld [vmem:[#allocation6 + $0x110] sm:$0xff] }
  0x3c   :  { %1625 = vmatpush1.bf16.msra.mxu1 %v2350_v58  ;;  %1595 = vmatprep.subr.bf16.mxu0 %v2352_v59  ;;  %v59_v20 = vld [vmem:[%s2738_s0 + $0x18] sm:$0xff]  ;;  %v2393_v26 = vpack.c.bf16 %v388_v18, %v384_v17  ;;  %v387_v27 = vld [vmem:[#allocation6 + $0x130] sm:$0xff]  ;;  %v390_v28 = vld [vmem:[#allocation6 + $0x148] sm:$0xff]  ;;  %v2399_v32 = vpack.c.bf16 %v385_v24, %v381_v23  ;;  %v84_v23 = vlaneseq }
  0x3d   :  { %1627 = vmatprep.subr.bf16.mxu1 %v2355_v63  ;;  %199 = vmatprep.mubr.f32.mxu0 %v2246_v0  ;;  %v394_v29 = vld [vmem:[#allocation6 + $0x168] sm:$0xff]  ;;  %v392_v30 = vld [vmem:[#allocation6 + $0x158] sm:$0xff]  ;;  %v60_v33 = vld [vmem:[%s2738_s0 + $0x20] sm:$0xff]  ;;  %v2407_v34 = vpack.c.bf16 %v387_v27, %v383_v25 }
  0x3e   :  { %300 = vmatprep.mubr.f32.mxu1 %v2246_v0  ;;  %1542 = vmatmul.mubr.msk.f32.gmra.mrb[4].mxu0 %vm104_vm0, %v58_v7  ;;  %v396_v31 = vld [vmem:[#allocation6 + $0x178] sm:$0xff]  ;;  %v2409_v36 = vpack.c.bf16 %v394_v29, %v390_v28  ;;  %v389_v37 = vld [vmem:[#allocation6 + $0x140] sm:$0xff]  ;;  %v391_v40 = vld [vmem:[#allocation6 + $0x150] sm:$0xff]  ;;  %v85_v24 = vshrl.u32 %v84_v23, 7 }
  0x3f   :  { %1597 = vmatpush1.bf16.msra.mxu0 %v2361_v6  ;;  %1548 = vmatmul.mubr.msk.f32.gmra.mrb[4].mxu1 %vm104_vm0, %v58_v7  ;;  %v393_v38 = vld [vmem:[#allocation6 + $0x160] sm:$0xff]  ;;  %v2412_v41 = vpack.c.bf16 %v396_v31, %v392_v30  ;;  %v395_v42 = vld [vmem:[#allocation6 + $0x170] sm:$0xff]  ;;  %v398_v43 = vld [vmem:[#allocation6 + $0x188] sm:$0xff] }
  0x40   :  { %1629 = vmatpush1.bf16.msra.mxu1 %v2369_v8  ;;  %1599 = vmatprep.subr.bf16.mxu0 %v2371_v9  ;;  %v402_v47 = vld [vmem:[#allocation6 + $0x1a8] sm:$0xff]  ;;  %v400_v48 = vld [vmem:[#allocation6 + $0x198] sm:$0xff]  ;;  %v2418_v51 = vpack.c.bf16 %v393_v38, %v389_v37  ;;  %v2426_v53 = vpack.c.bf16 %v395_v42, %v391_v40  ;;  %v397_v55 = vld [vmem:[#allocation6 + $0x180] sm:$0xff]  ;;  %v86_v25 = vsub.s32 0, %v85_v24  ;;  %v90_v28 = vsub.s32 1, %v85_v24 }
  0x41   :  { %1631 = vmatprep.subr.bf16.mxu1 %v2374_v13  ;;  %205 = vmatprep.mubr.f32.mxu0 %v2246_v0  ;;  %v404_v49 = vld [vmem:[#allocation6 + $0x1b8] sm:$0xff]  ;;  %v61_v52 = vld [vmem:[%s2738_s0 + $0x28] sm:$0xff]  ;;  %v2428_v54 = vpack.c.bf16 %v402_v47, %v398_v43  ;;  %v401_v57 = vld [vmem:[#allocation6 + $0x1a0] sm:$0xff] }
  0x42   :  { %306 = vmatprep.mubr.f32.mxu1 %v2246_v0  ;;  %1543 = vmatmul.mubr.msk.f32.gmra.mrb[6].mxu0 %vm104_vm0, %v59_v20  ;;  %v399_v60 = vld [vmem:[#allocation6 + $0x190] sm:$0xff]  ;;  %v2431_v61 = vpack.c.bf16 %v404_v49, %v400_v48  ;;  %v406_v1 = vld [vmem:[#allocation6 + $0x1c8] sm:$0xff]  ;;  %v408_v3 = vld [vmem:[#allocation6 + $0x1d8] sm:$0xff]  ;;  %v2437_v5 = vpack.c.bf16 %v401_v57, %v397_v55 }
  0x43   :  { %1601 = vmatpush1.bf16.msra.mxu0 %v2380_v19  ;;  %1549 = vmatmul.mubr.msk.f32.gmra.mrb[6].mxu1 %vm104_vm0, %v59_v20  ;;  %v403_v62 = vld [vmem:[#allocation6 + $0x1b0] sm:$0xff]  ;;  %v410_v2 = vld [vmem:[#allocation6 + $0x1e8] sm:$0xff]  ;;  %v412_v4 = vld [vmem:[#allocation6 + $0x1f8] sm:$0xff] }
  0x44   :  { %1633 = vmatpush1.bf16.msra.mxu1 %v2388_v21  ;;  %1603 = vmatprep.subr.bf16.mxu0 %v2390_v22  ;;  %v2442_v7 = vpack.c.bf16 %v403_v62, %v399_v60  ;;  %v2444_v10 = vpack.c.bf16 %v410_v2, %v406_v1  ;;  %v405_v11 = vld [vmem:[#allocation6 + $0x1c0] sm:$0xff]  ;;  %v2447_v14 = vpack.c.bf16 %v412_v4, %v408_v3  ;;  %v407_v15 = vld [vmem:[#allocation6 + $0x1d0] sm:$0xff] }
  0x45   :  { %1635 = vmatprep.subr.bf16.mxu1 %v2393_v26  ;;  %211 = vmatprep.mubr.f32.mxu0 %v2246_v0  ;;  %v409_v12 = vld [vmem:[#allocation6 + $0x1e0] sm:$0xff]  ;;  %v411_v16 = vld [vmem:[#allocation6 + $0x1f0] sm:$0xff] }
  0x46   :  { %312 = vmatprep.mubr.f32.mxu1 %v2246_v0  ;;  %1544 = vmatmul.mubr.msk.f32.gmra.mrb[8].mxu0 %vm104_vm0, %v60_v33  ;;  %v2452_v17 = vpack.c.bf16 %v409_v12, %v405_v11  ;;  %v2456_v18 = vpack.c.bf16 %v411_v16, %v407_v15  ;;  %v413_v20 = vld [vmem:[%s2739_s1] sm:$0xff] }
  0x47   :  { %1605 = vmatpush1.bf16.msra.mxu0 %v2399_v32  ;;  %1550 = vmatmul.mubr.msk.f32.gmra.mrb[8].mxu1 %vm104_vm0, %v60_v33  ;;  %v82_v27 = vld [vmem:[%s2743_s5] sm:$0xf]  ;;  %v98_v33 = vsub.s32 3, %v85_v24 }
  0x48   :  { %1637 = vmatpush1.bf16.msra.mxu1 %v2407_v34  ;;  %1607 = vmatprep.subr.bf16.mxu0 %v2409_v36  ;;  %v2503_v29 = vrot.slane %v82_v27, %v86_v25  ;;  %v2505_v30 = vrot.slane %v82_v27, %v90_v28  ;;  %v414_v15 = vld [vmem:[%s2740_s2] sm:$0xff]  ;;  %s2247_s2 = smov [#allocation9]  }
  0x49   :  { %1639 = vmatprep.subr.bf16.mxu1 %v2412_v41  ;;  %217 = vmatprep.mubr.f32.mxu0 %v2246_v0  ;;  %v2509_v49 = vrot.slane %v82_v27, %v98_v33  ;;  %s1508_s22 = sshll.u32 %s2247_s2, 4  ;;  %s1509_s22 = int_to_ptr.vmem [resolvable:$true] %s1508_s22 }
  0x4a   :  { %318 = vmatprep.mubr.f32.mxu1 %v2246_v0  ;;  %1545 = vmatmul.mubr.msk.f32.gmra.mrb[10].mxu0 %vm104_vm0, %v61_v52  ;;  %s2168_s27 = scalar_lea.vmem %s1509_s22, 128  ;;  %p2173_p3 = scmp.lt.s32.totalorder %s1509_s22, %s1509_s22 }
  0x4b   :  { %1609 = vmatpush1.bf16.msra.mxu0 %v2418_v51  ;;  %1551 = vmatmul.mubr.msk.f32.gmra.mrb[10].mxu1 %vm104_vm0, %v61_v52  ;;  %v94_v52 = vsub.s32 2, %v85_v24  ;;  %p2169_p2 = scmp.ne.s32.totalorder %s1509_s22, %s2168_s27  ;;  %p2174_p4 = scmp.lt.s32.totalorder %s2168_s27, %s2168_s27 }
  0x4c   :  { %1641 = vmatpush1.bf16.msra.mxu1 %v2426_v53  ;;  %1611 = vmatprep.subr.bf16.mxu0 %v2428_v54 }
  0x4d   :  { %1643 = vmatprep.subr.bf16.mxu1 %v2431_v61  ;;  %486 = vmatprep.mubr.f32.mxu0 %v2246_v0  ;;  %v2512_v57 = vrot.slane %v82_v27, %v94_v52  ;;  %p2175_p5 = por %p2174_p4, %p2173_p3 }
  0x4e   :  { %557 = vmatprep.mubr.f32.mxu1 %v2246_v0 }
  0x4f   :  { %1613 = vmatpush1.bf16.msra.mxu0 %v2437_v5  ;;  %p2176_p6 = pnand %p2175_p5, %p2169_p2 }
  0x50   :  { %1645 = vmatpush1.bf16.msra.mxu1 %v2442_v7  ;;  %1615 = vmatprep.subr.bf16.mxu0 %v2444_v10 }
  0x51   :  { %1647 = vmatprep.subr.bf16.mxu1 %v2447_v14 }
  0x53   :  { %1617 = vmatpush1.bf16.msra.mxu0 %v2452_v17 }
  0x54   :  { %1649 = vmatpush1.bf16.msra.mxu1 %v2456_v18  ;;  %1651 = vmatprep.subr.bf16.mxu0 %v2323_v35 }
  0x55   :  { %1683 = vmatprep.subr.bf16.mxu1 %v2325_v39 }
  0x56   :  { %487 = vmatmul.mubr.f32.vlgmr.msra.gmra.mrb[0].mxu0 %v413_v20 }
  0x57   :  { %558 = vmatmul.mubr.f32.vlgmr.msra.gmra.mrb[0].mxu1 %v413_v20  ;;  %1653 = vmatpush1.bf16.msra.mxu0 %v2330_v44 }
  0x58   :  { %1685 = vmatpush1.bf16.msra.mxu1 %v2332_v45  ;;  %1655 = vmatprep.subr.bf16.mxu0 %v2334_v46 }
  0x59   :  { %1687 = vmatprep.subr.bf16.mxu1 %v2337_v50  ;;  %664 = vmatprep.mubr.f32.mxu0 %v2246_v0 }
  0x5a   :  { %735 = vmatprep.mubr.f32.mxu1 %v2246_v0 }
  0x5b   :  { %1657 = vmatpush1.bf16.msra.mxu0 %v2343_v56 }
  0x5c   :  { %1689 = vmatpush1.bf16.msra.mxu1 %v2350_v58  ;;  %1659 = vmatprep.subr.bf16.mxu0 %v2352_v59 }
  0x5d   :  { %1691 = vmatprep.subr.bf16.mxu1 %v2355_v63 }
  0x5f   :  { %1661 = vmatpush1.bf16.msra.mxu0 %v2361_v6 }
  0x60   :  { %1693 = vmatpush1.bf16.msra.mxu1 %v2369_v8  ;;  %1663 = vmatprep.subr.bf16.mxu0 %v2371_v9 }
  0x61   :  { %1695 = vmatprep.subr.bf16.mxu1 %v2374_v13 }
  0x63   :  { %1665 = vmatpush1.bf16.msra.mxu0 %v2380_v19 }
  0x64   :  { %1697 = vmatpush1.bf16.msra.mxu1 %v2388_v21  ;;  %1667 = vmatprep.subr.bf16.mxu0 %v2390_v22 }
  0x65   :  { %1699 = vmatprep.subr.bf16.mxu1 %v2393_v26 }
  0x67   :  { %1669 = vmatpush1.bf16.msra.mxu0 %v2399_v32 }
  0x68   :  { %1701 = vmatpush1.bf16.msra.mxu1 %v2407_v34  ;;  %1671 = vmatprep.subr.bf16.mxu0 %v2409_v36 }
  0x69   :  { %1703 = vmatprep.subr.bf16.mxu1 %v2412_v41 }
  0x6b   :  { %1673 = vmatpush1.bf16.msra.mxu0 %v2418_v51 }
  0x6c   :  { %1705 = vmatpush1.bf16.msra.mxu1 %v2426_v53  ;;  %1675 = vmatprep.subr.bf16.mxu0 %v2428_v54 }
  0x6d   :  { %1707 = vmatprep.subr.bf16.mxu1 %v2431_v61 }
  0x6f   :  { %1677 = vmatpush1.bf16.msra.mxu0 %v2437_v5 }
  0x70   :  { %1709 = vmatpush1.bf16.msra.mxu1 %v2442_v7  ;;  %1679 = vmatprep.subr.bf16.mxu0 %v2444_v10 }
  0x71   :  { %1711 = vmatprep.subr.bf16.mxu1 %v2447_v14 }
  0x73   :  { %1681 = vmatpush1.bf16.msra.mxu0 %v2452_v17 }
  0x74   :  { %1713 = vmatpush1.bf16.msra.mxu1 %v2456_v18  ;;  %1715 = vmatprep.subr.bf16.mxu0 %v2323_v35 }
  0x75   :  { %1747 = vmatprep.subr.bf16.mxu1 %v2325_v39 }
 0x129   :  { %v488_v31 = vpop.f32.mrb[0].mxu0 }
 0x12a   :  { %v1970_v37 = vadd.f32 %v488_v31, %v2503_v29  ;;  %v559_v38 = vpop.f32.mrb[0].mxu1  ;;  %v490_v40 = vpop.f32.mrb[1].mxu0 }
 0x12b   :  { %v1971_v42 = vadd.f32 %v490_v40, %v2505_v30  ;;  %v561_v43 = vpop.f32.mrb[1].mxu1  ;;  %v1982_v62 = vadd.f32 %v559_v38, %v2512_v57 }
 0x12c   :  { %v1552_v47 = vmul.f32 -1.442695, %v1970_v37  ;;  %v1983_v55 = vadd.f32 %v561_v43, %v2509_v49 }
 0x12d   :  { %v1553_v48 = vmul.f32 -1.442695, %v1971_v42 }
 0x12e   :  { %2028 = vpow2.f32 %v1552_v47  ;;  %v1554_v60 = vmul.f32 -1.442695, %v1983_v55 }
 0x12f   :  { %2030 = vpow2.f32 %v1553_v48 }
 0x130   :  { %2032 = vpow2.f32 %v1554_v60 }
 0x131   :  { %2034 = vtanh.f32 %v1982_v62 }
 0x138   :  { %v2029_v1 = vpop.eup %2028 }
 0x139   :  { %v2031_v2 = vpop.eup %2030  ;;  %v571_v3 = vadd.f32 1.0, %v2029_v1 }
 0x13a   :  { %v577_v4 = vadd.f32 1.0, %v2031_v2  ;;  %v2033_v11 = vpop.eup %2032 }
 0x13b   :  { %2036 = vrcp.f32 %v571_v3  ;;  %v2035_v12 = vpop.eup %2034  ;;  %v584_v24 = vadd.f32 1.0, %v2033_v11 }
 0x13c   :  { %2038 = vrcp.f32 %v577_v4 }
 0x13d   :  { %2040 = vrcp.f32 %v584_v24 }
 0x145   :  { %v2037_v16 = vpop.eup %2036 }
 0x146   :  { %v2039_v20 = vpop.eup %2038  ;;  %v588_v23 = vmul.f32 %v2037_v16, %v2035_v12 }
 0x147   :  { %v587_v25 = vmul.f32 %v2039_v20, %v414_v15  ;;  %v2041_v28 = vpop.eup %2040 }
 0x149   :  { %v2518_v27 = vadd.f32 %v588_v23, %v587_v25 }
 0x14b   :  { %2042 = vtanh.f32 %v2518_v27 }
 0x155   :  { %v2043_v31 = vpop.eup %2042 }
 0x156   :  { %v591_v33 = vmul.f32 %v2043_v31, %v2041_v28 }
 0x158   :  { %592 = vst [vmem:[#allocation8] sm:$0xff] %v591_v33  ;;  %665 = vmatmul.mubr.f32.vlgmr.msra.gmra.mrb[2].mxu0 %v591_v33  ;;  %736 = vmatmul.mubr.f32.vlgmr.msra.gmra.mrb[2].mxu1 %v591_v33 }
 0x159   :  { %1717 = vmatpush1.bf16.msra.mxu0 %v2330_v44  ;;  %1749 = vmatpush1.bf16.msra.mxu1 %v2332_v45 }
 0x15a   :  { %1719 = vmatprep.subr.bf16.mxu0 %v2334_v46  ;;  %1751 = vmatprep.subr.bf16.mxu1 %v2337_v50 }
 0x15b   :  { %843 = vmatprep.mubr.f32.mxu0 %v2246_v0  ;;  %914 = vmatprep.mubr.f32.mxu1 %v2246_v0 }
 0x15d   :  { %1721 = vmatpush1.bf16.msra.mxu0 %v2343_v56  ;;  %1753 = vmatpush1.bf16.msra.mxu1 %v2350_v58 }
 0x15e   :  { %1723 = vmatprep.subr.bf16.mxu0 %v2352_v59  ;;  %1755 = vmatprep.subr.bf16.mxu1 %v2355_v63 }
 0x161   :  { %1725 = vmatpush1.bf16.msra.mxu0 %v2361_v6  ;;  %1757 = vmatpush1.bf16.msra.mxu1 %v2369_v8 }
 0x162   :  { %1727 = vmatprep.subr.bf16.mxu0 %v2371_v9  ;;  %1759 = vmatprep.subr.bf16.mxu1 %v2374_v13 }
 0x165   :  { %1729 = vmatpush1.bf16.msra.mxu0 %v2380_v19  ;;  %1761 = vmatpush1.bf16.msra.mxu1 %v2388_v21 }
 0x166   :  { %1731 = vmatprep.subr.bf16.mxu0 %v2390_v22  ;;  %1763 = vmatprep.subr.bf16.mxu1 %v2393_v26 }
 0x169   :  { %1733 = vmatpush1.bf16.msra.mxu0 %v2399_v32  ;;  %1765 = vmatpush1.bf16.msra.mxu1 %v2407_v34 }
 0x16a   :  { %1735 = vmatprep.subr.bf16.mxu0 %v2409_v36  ;;  %1767 = vmatprep.subr.bf16.mxu1 %v2412_v41 }
 0x16d   :  { %1737 = vmatpush1.bf16.msra.mxu0 %v2418_v51  ;;  %1769 = vmatpush1.bf16.msra.mxu1 %v2426_v53 }
 0x16e   :  { %1739 = vmatprep.subr.bf16.mxu0 %v2428_v54  ;;  %1771 = vmatprep.subr.bf16.mxu1 %v2431_v61 }
 0x171   :  { %1741 = vmatpush1.bf16.msra.mxu0 %v2437_v5  ;;  %1773 = vmatpush1.bf16.msra.mxu1 %v2442_v7 }
 0x172   :  { %1743 = vmatprep.subr.bf16.mxu0 %v2444_v10  ;;  %1775 = vmatprep.subr.bf16.mxu1 %v2447_v14 }
 0x175   :  { %1745 = vmatpush1.bf16.msra.mxu0 %v2452_v17  ;;  %1777 = vmatpush1.bf16.msra.mxu1 %v2456_v18 }
 0x176   :  { %1779 = vmatprep.subr.bf16.mxu0 %v2323_v35  ;;  %1811 = vmatprep.subr.bf16.mxu1 %v2325_v39 }
 0x22b   :  { %v666_v37 = vpop.f32.mrb[2].mxu0  ;;  %v737_v38 = vpop.f32.mrb[2].mxu1 }
 0x22c   :  { %v1972_v40 = vadd.f32 %v666_v37, %v2503_v29  ;;  %v668_v42 = vpop.f32.mrb[3].mxu0  ;;  %v739_v43 = vpop.f32.mrb[3].mxu1  ;;  %v1984_v62 = vadd.f32 %v737_v38, %v2512_v57 }
 0x22d   :  { %v1973_v47 = vadd.f32 %v668_v42, %v2505_v30  ;;  %v1985_v55 = vadd.f32 %v739_v43, %v2509_v49 }
 0x22e   :  { %v1555_v48 = vmul.f32 -1.442695, %v1972_v40 }
 0x22f   :  { %v1556_v52 = vmul.f32 -1.442695, %v1973_v47  ;;  %v1557_v60 = vmul.f32 -1.442695, %v1985_v55 }
 0x230   :  { %2044 = vpow2.f32 %v1555_v48 }
 0x231   :  { %2046 = vpow2.f32 %v1556_v52 }
 0x232   :  { %2048 = vpow2.f32 %v1557_v60 }
 0x233   :  { %2050 = vtanh.f32 %v1984_v62 }
 0x23a   :  { %v2045_v1 = vpop.eup %2044 }
 0x23b   :  { %v2047_v2 = vpop.eup %2046  ;;  %v749_v3 = vadd.f32 1.0, %v2045_v1 }
 0x23c   :  { %v755_v4 = vadd.f32 1.0, %v2047_v2  ;;  %v2049_v11 = vpop.eup %2048 }
 0x23d   :  { %2052 = vrcp.f32 %v749_v3  ;;  %v2051_v12 = vpop.eup %2050  ;;  %v762_v23 = vadd.f32 1.0, %v2049_v11 }
 0x23e   :  { %2054 = vrcp.f32 %v755_v4 }
 0x23f   :  { %2056 = vrcp.f32 %v762_v23 }
 0x247   :  { %v2053_v15 = vpop.eup %2052 }
 0x248   :  { %v2055_v16 = vpop.eup %2054  ;;  %v766_v20 = vmul.f32 %v2053_v15, %v2051_v12 }
 0x249   :  { %v765_v24 = vmul.f32 %v2055_v16, %v2518_v27  ;;  %v2057_v28 = vpop.eup %2056 }
 0x24b   :  { %v2560_v25 = vadd.f32 %v766_v20, %v765_v24 }
 0x24d   :  { %2058 = vtanh.f32 %v2560_v25 }
 0x257   :  { %v2059_v31 = vpop.eup %2058 }
 0x258   :  { %v769_v33 = vmul.f32 %v2059_v31, %v2057_v28 }
 0x25a   :  { %771 = vst [vmem:[#allocation8 + $0x8] sm:$0xff] %v769_v33  ;;  %844 = vmatmul.mubr.f32.vlgmr.msra.gmra.mrb[4].mxu0 %v769_v33  ;;  %915 = vmatmul.mubr.f32.vlgmr.msra.gmra.mrb[4].mxu1 %v769_v33 }
 0x25b   :  { %1781 = vmatpush1.bf16.msra.mxu0 %v2330_v44  ;;  %1813 = vmatpush1.bf16.msra.mxu1 %v2332_v45 }
 0x25c   :  { %1783 = vmatprep.subr.bf16.mxu0 %v2334_v46  ;;  %1815 = vmatprep.subr.bf16.mxu1 %v2337_v50 }
 0x25d   :  { %1022 = vmatprep.mubr.f32.mxu0 %v2246_v0  ;;  %1093 = vmatprep.mubr.f32.mxu1 %v2246_v0 }
 0x25f   :  { %1785 = vmatpush1.bf16.msra.mxu0 %v2343_v56  ;;  %1817 = vmatpush1.bf16.msra.mxu1 %v2350_v58 }
 0x260   :  { %1787 = vmatprep.subr.bf16.mxu0 %v2352_v59  ;;  %1819 = vmatprep.subr.bf16.mxu1 %v2355_v63 }
 0x263   :  { %1789 = vmatpush1.bf16.msra.mxu0 %v2361_v6  ;;  %1821 = vmatpush1.bf16.msra.mxu1 %v2369_v8 }
 0x264   :  { %1791 = vmatprep.subr.bf16.mxu0 %v2371_v9  ;;  %1823 = vmatprep.subr.bf16.mxu1 %v2374_v13 }
 0x267   :  { %1793 = vmatpush1.bf16.msra.mxu0 %v2380_v19  ;;  %1825 = vmatpush1.bf16.msra.mxu1 %v2388_v21 }
 0x268   :  { %1795 = vmatprep.subr.bf16.mxu0 %v2390_v22  ;;  %1827 = vmatprep.subr.bf16.mxu1 %v2393_v26 }
 0x26b   :  { %1797 = vmatpush1.bf16.msra.mxu0 %v2399_v32  ;;  %1829 = vmatpush1.bf16.msra.mxu1 %v2407_v34 }
 0x26c   :  { %1799 = vmatprep.subr.bf16.mxu0 %v2409_v36  ;;  %1831 = vmatprep.subr.bf16.mxu1 %v2412_v41 }
 0x26f   :  { %1801 = vmatpush1.bf16.msra.mxu0 %v2418_v51  ;;  %1833 = vmatpush1.bf16.msra.mxu1 %v2426_v53 }
 0x270   :  { %1803 = vmatprep.subr.bf16.mxu0 %v2428_v54  ;;  %1835 = vmatprep.subr.bf16.mxu1 %v2431_v61 }
 0x273   :  { %1805 = vmatpush1.bf16.msra.mxu0 %v2437_v5  ;;  %1837 = vmatpush1.bf16.msra.mxu1 %v2442_v7 }
 0x274   :  { %1807 = vmatprep.subr.bf16.mxu0 %v2444_v10  ;;  %1839 = vmatprep.subr.bf16.mxu1 %v2447_v14 }
 0x277   :  { %1809 = vmatpush1.bf16.msra.mxu0 %v2452_v17  ;;  %1841 = vmatpush1.bf16.msra.mxu1 %v2456_v18 }
 0x278   :  { %1843 = vmatprep.subr.bf16.mxu0 %v2323_v35  ;;  %1875 = vmatprep.subr.bf16.mxu1 %v2325_v39 }
 0x32d   :  { %v845_v27 = vpop.f32.mrb[4].mxu0  ;;  %v916_v37 = vpop.f32.mrb[4].mxu1 }
 0x32e   :  { %v1974_v38 = vadd.f32 %v845_v27, %v2503_v29  ;;  %v847_v40 = vpop.f32.mrb[5].mxu0  ;;  %v918_v42 = vpop.f32.mrb[5].mxu1  ;;  %v1986_v60 = vadd.f32 %v916_v37, %v2512_v57 }
 0x32f   :  { %v1975_v43 = vadd.f32 %v847_v40, %v2505_v30  ;;  %v1987_v52 = vadd.f32 %v918_v42, %v2509_v49 }
 0x330   :  { %v1558_v47 = vmul.f32 -1.442695, %v1974_v38 }
 0x331   :  { %v1559_v48 = vmul.f32 -1.442695, %v1975_v43  ;;  %v1560_v55 = vmul.f32 -1.442695, %v1987_v52 }
 0x332   :  { %2060 = vpow2.f32 %v1558_v47 }
 0x333   :  { %2062 = vpow2.f32 %v1559_v48 }
 0x334   :  { %2064 = vpow2.f32 %v1560_v55 }
 0x335   :  { %2066 = vtanh.f32 %v1986_v60 }
 0x33c   :  { %v2061_v62 = vpop.eup %2060 }
 0x33d   :  { %v2063_v1 = vpop.eup %2062  ;;  %v928_v2 = vadd.f32 1.0, %v2061_v62 }
 0x33e   :  { %v934_v3 = vadd.f32 1.0, %v2063_v1  ;;  %v2065_v4 = vpop.eup %2064 }
 0x33f   :  { %2068 = vrcp.f32 %v928_v2  ;;  %v2067_v11 = vpop.eup %2066  ;;  %v941_v20 = vadd.f32 1.0, %v2065_v4 }
 0x340   :  { %2070 = vrcp.f32 %v934_v3 }
 0x341   :  { %2072 = vrcp.f32 %v941_v20 }
 0x349   :  { %v2069_v12 = vpop.eup %2068 }
 0x34a   :  { %v2071_v15 = vpop.eup %2070  ;;  %v945_v16 = vmul.f32 %v2069_v12, %v2067_v11 }
 0x34b   :  { %v944_v23 = vmul.f32 %v2071_v15, %v2560_v25  ;;  %v2073_v28 = vpop.eup %2072 }
 0x34d   :  { %v2602_v24 = vadd.f32 %v945_v16, %v944_v23 }
 0x34f   :  { %2074 = vtanh.f32 %v2602_v24 }
 0x359   :  { %v2075_v31 = vpop.eup %2074 }
 0x35a   :  { %v948_v33 = vmul.f32 %v2075_v31, %v2073_v28 }
 0x35c   :  { %950 = vst [vmem:[#allocation8 + $0x10] sm:$0xff] %v948_v33  ;;  %1023 = vmatmul.mubr.f32.vlgmr.msra.gmra.mrb[6].mxu0 %v948_v33  ;;  %1094 = vmatmul.mubr.f32.vlgmr.msra.gmra.mrb[6].mxu1 %v948_v33 }
 0x35d   :  { %1845 = vmatpush1.bf16.msra.mxu0 %v2330_v44  ;;  %1877 = vmatpush1.bf16.msra.mxu1 %v2332_v45 }
 0x35e   :  { %1847 = vmatprep.subr.bf16.mxu0 %v2334_v46  ;;  %1879 = vmatprep.subr.bf16.mxu1 %v2337_v50 }
 0x35f   :  { %1201 = vmatprep.mubr.f32.mxu0 %v2246_v0  ;;  %1272 = vmatprep.mubr.f32.mxu1 %v2246_v0 }
 0x361   :  { %1849 = vmatpush1.bf16.msra.mxu0 %v2343_v56  ;;  %1881 = vmatpush1.bf16.msra.mxu1 %v2350_v58 }
 0x362   :  { %1851 = vmatprep.subr.bf16.mxu0 %v2352_v59  ;;  %1883 = vmatprep.subr.bf16.mxu1 %v2355_v63 }
 0x365   :  { %1853 = vmatpush1.bf16.msra.mxu0 %v2361_v6  ;;  %1885 = vmatpush1.bf16.msra.mxu1 %v2369_v8 }
 0x366   :  { %1855 = vmatprep.subr.bf16.mxu0 %v2371_v9  ;;  %1887 = vmatprep.subr.bf16.mxu1 %v2374_v13 }
 0x369   :  { %1857 = vmatpush1.bf16.msra.mxu0 %v2380_v19  ;;  %1889 = vmatpush1.bf16.msra.mxu1 %v2388_v21 }
 0x36a   :  { %1859 = vmatprep.subr.bf16.mxu0 %v2390_v22  ;;  %1891 = vmatprep.subr.bf16.mxu1 %v2393_v26 }
 0x36d   :  { %1861 = vmatpush1.bf16.msra.mxu0 %v2399_v32  ;;  %1893 = vmatpush1.bf16.msra.mxu1 %v2407_v34 }
 0x36e   :  { %1863 = vmatprep.subr.bf16.mxu0 %v2409_v36  ;;  %1895 = vmatprep.subr.bf16.mxu1 %v2412_v41 }
 0x371   :  { %1865 = vmatpush1.bf16.msra.mxu0 %v2418_v51  ;;  %1897 = vmatpush1.bf16.msra.mxu1 %v2426_v53 }
 0x372   :  { %1867 = vmatprep.subr.bf16.mxu0 %v2428_v54  ;;  %1899 = vmatprep.subr.bf16.mxu1 %v2431_v61 }
 0x375   :  { %1869 = vmatpush1.bf16.msra.mxu0 %v2437_v5  ;;  %1901 = vmatpush1.bf16.msra.mxu1 %v2442_v7 }
 0x376   :  { %1871 = vmatprep.subr.bf16.mxu0 %v2444_v10  ;;  %1903 = vmatprep.subr.bf16.mxu1 %v2447_v14 }
 0x379   :  { %1873 = vmatpush1.bf16.msra.mxu0 %v2452_v17  ;;  %1905 = vmatpush1.bf16.msra.mxu1 %v2456_v18 }
 0x37a   :  { %1907 = vmatprep.subr.bf16.mxu0 %v2323_v35  ;;  %1939 = vmatprep.subr.bf16.mxu1 %v2325_v39 }
 0x42f   :  { %v1024_v25 = vpop.f32.mrb[6].mxu0  ;;  %v1095_v27 = vpop.f32.mrb[6].mxu1 }
 0x430   :  { %v1976_v37 = vadd.f32 %v1024_v25, %v2503_v29  ;;  %v1026_v38 = vpop.f32.mrb[7].mxu0  ;;  %v1097_v40 = vpop.f32.mrb[7].mxu1  ;;  %v1988_v55 = vadd.f32 %v1095_v27, %v2512_v57 }
 0x431   :  { %v1977_v42 = vadd.f32 %v1026_v38, %v2505_v30  ;;  %v1989_v48 = vadd.f32 %v1097_v40, %v2509_v49 }
 0x432   :  { %v1561_v43 = vmul.f32 -1.442695, %v1976_v37 }
 0x433   :  { %v1562_v47 = vmul.f32 -1.442695, %v1977_v42  ;;  %v1563_v52 = vmul.f32 -1.442695, %v1989_v48 }
 0x434   :  { %2076 = vpow2.f32 %v1561_v43 }
 0x435   :  { %2078 = vpow2.f32 %v1562_v47 }
 0x436   :  { %2080 = vpow2.f32 %v1563_v52 }
 0x437   :  { %2082 = vtanh.f32 %v1988_v55 }
 0x43e   :  { %v2077_v35 = vpop.eup %2076 }
 0x43f   :  { %v2079_v60 = vpop.eup %2078  ;;  %v1107_v39 = vadd.f32 1.0, %v2077_v35 }
 0x440   :  { %v1113_v62 = vadd.f32 1.0, %v2079_v60  ;;  %v2081_v1 = vpop.eup %2080 }
 0x441   :  { %2084 = vrcp.f32 %v1107_v39  ;;  %v2083_v2 = vpop.eup %2082  ;;  %v1120_v12 = vadd.f32 1.0, %v2081_v1 }
 0x442   :  { %2086 = vrcp.f32 %v1113_v62 }
 0x443   :  { %2088 = vrcp.f32 %v1120_v12 }
 0x44b   :  { %v2085_v3 = vpop.eup %2084 }
 0x44c   :  { %v2087_v4 = vpop.eup %2086  ;;  %v1124_v11 = vmul.f32 %v2085_v3, %v2083_v2 }
 0x44d   :  { %v1123_v15 = vmul.f32 %v2087_v4, %v2602_v24  ;;  %v2089_v20 = vpop.eup %2088 }
 0x44f   :  { %v2644_v16 = vadd.f32 %v1124_v11, %v1123_v15 }
 0x451   :  { %2090 = vtanh.f32 %v2644_v16 }
 0x45b   :  { %v2091_v23 = vpop.eup %2090 }
 0x45c   :  { %v1127_v28 = vmul.f32 %v2091_v23, %v2089_v20 }
 0x45e   :  { %1129 = vst [vmem:[#allocation8 + $0x18] sm:$0xff] %v1127_v28  ;;  %1202 = vmatmul.mubr.f32.vlgmr.msra.gmra.mrb[8].mxu0 %v1127_v28  ;;  %1273 = vmatmul.mubr.f32.vlgmr.msra.gmra.mrb[8].mxu1 %v1127_v28 }
 0x45f   :  { %1909 = vmatpush1.bf16.msra.mxu0 %v2330_v44  ;;  %1941 = vmatpush1.bf16.msra.mxu1 %v2332_v45 }
 0x460   :  { %1911 = vmatprep.subr.bf16.mxu0 %v2334_v46  ;;  %1943 = vmatprep.subr.bf16.mxu1 %v2337_v50 }
 0x461   :  { %1380 = vmatprep.mubr.f32.mxu0 %v2246_v0  ;;  %1451 = vmatprep.mubr.f32.mxu1 %v2246_v0 }
 0x463   :  { %1913 = vmatpush1.bf16.msra.mxu0 %v2343_v56  ;;  %1945 = vmatpush1.bf16.msra.mxu1 %v2350_v58 }
 0x464   :  { %1915 = vmatprep.subr.bf16.mxu0 %v2352_v59  ;;  %1947 = vmatprep.subr.bf16.mxu1 %v2355_v63 }
 0x467   :  { %1917 = vmatpush1.bf16.msra.mxu0 %v2361_v6  ;;  %1949 = vmatpush1.bf16.msra.mxu1 %v2369_v8 }
 0x468   :  { %1919 = vmatprep.subr.bf16.mxu0 %v2371_v9  ;;  %1951 = vmatprep.subr.bf16.mxu1 %v2374_v13 }
 0x46b   :  { %1921 = vmatpush1.bf16.msra.mxu0 %v2380_v19  ;;  %1953 = vmatpush1.bf16.msra.mxu1 %v2388_v21 }
 0x46c   :  { %1923 = vmatprep.subr.bf16.mxu0 %v2390_v22  ;;  %1955 = vmatprep.subr.bf16.mxu1 %v2393_v26 }
 0x46f   :  { %1925 = vmatpush1.bf16.msra.mxu0 %v2399_v32  ;;  %1957 = vmatpush1.bf16.msra.mxu1 %v2407_v34 }
 0x470   :  { %1927 = vmatprep.subr.bf16.mxu0 %v2409_v36  ;;  %1959 = vmatprep.subr.bf16.mxu1 %v2412_v41 }
 0x473   :  { %1929 = vmatpush1.bf16.msra.mxu0 %v2418_v51  ;;  %1961 = vmatpush1.bf16.msra.mxu1 %v2426_v53 }
 0x474   :  { %1931 = vmatprep.subr.bf16.mxu0 %v2428_v54  ;;  %1963 = vmatprep.subr.bf16.mxu1 %v2431_v61 }
 0x477   :  { %1933 = vmatpush1.bf16.msra.mxu0 %v2437_v5  ;;  %1965 = vmatpush1.bf16.msra.mxu1 %v2442_v7 }
 0x478   :  { %1935 = vmatprep.subr.bf16.mxu0 %v2444_v10  ;;  %1967 = vmatprep.subr.bf16.mxu1 %v2447_v14 }
 0x47b   :  { %1937 = vmatpush1.bf16.msra.mxu0 %v2452_v17  ;;  %1969 = vmatpush1.bf16.msra.mxu1 %v2456_v18 }
 0x531   :  { %v1203_v0 = vpop.f32.mrb[8].mxu0  ;;  %v1274_v44 = vpop.f32.mrb[8].mxu1 }
 0x532   :  { %v1978_v45 = vadd.f32 %v1203_v0, %v2503_v29  ;;  %v1205_v46 = vpop.f32.mrb[9].mxu0  ;;  %v1276_v50 = vpop.f32.mrb[9].mxu1  ;;  %v1990_v8 = vadd.f32 %v1274_v44, %v2512_v57 }
 0x533   :  { %v1979_v56 = vadd.f32 %v1205_v46, %v2505_v30  ;;  %v1991_v63 = vadd.f32 %v1276_v50, %v2509_v49 }
 0x534   :  { %v1564_v58 = vmul.f32 -1.442695, %v1978_v45 }
 0x535   :  { %v1565_v59 = vmul.f32 -1.442695, %v1979_v56  ;;  %v1566_v6 = vmul.f32 -1.442695, %v1991_v63 }
 0x536   :  { %2092 = vpow2.f32 %v1564_v58 }
 0x537   :  { %2094 = vpow2.f32 %v1565_v59 }
 0x538   :  { %2096 = vpow2.f32 %v1566_v6 }
 0x539   :  { %2098 = vtanh.f32 %v1990_v8 }
 0x540   :  { %v2093_v9 = vpop.eup %2092 }
 0x541   :  { %v2095_v13 = vpop.eup %2094  ;;  %v1286_v19 = vadd.f32 1.0, %v2093_v9 }
 0x542   :  { %v1292_v21 = vadd.f32 1.0, %v2095_v13  ;;  %v2097_v22 = vpop.eup %2096 }
 0x543   :  { %2100 = vrcp.f32 %v1286_v19  ;;  %v2099_v26 = vpop.eup %2098  ;;  %v1299_v41 = vadd.f32 1.0, %v2097_v22 }
 0x544   :  { %2102 = vrcp.f32 %v1292_v21 }
 0x545   :  { %2104 = vrcp.f32 %v1299_v41 }
 0x54d   :  { %v2101_v32 = vpop.eup %2100 }
 0x54e   :  { %v2103_v34 = vpop.eup %2102  ;;  %v1303_v36 = vmul.f32 %v2101_v32, %v2099_v26 }
 0x54f   :  { %v1302_v51 = vmul.f32 %v2103_v34, %v2644_v16  ;;  %v2105_v54 = vpop.eup %2104 }
 0x551   :  { %v1304_v53 = vadd.f32 %v1303_v36, %v1302_v51 }
 0x553   :  { %2106 = vtanh.f32 %v1304_v53 }
 0x55d   :  { %v2107_v61 = vpop.eup %2106 }
 0x55e   :  { %v1306_v5 = vmul.f32 %v2107_v61, %v2105_v54 }
 0x560   :  { %1308 = vst [vmem:[#allocation8 + $0x20] sm:$0xff] %v1306_v5  ;;  %1381 = vmatmul.mubr.f32.vlgmr.msra.gmra.mrb[10].mxu0 %v1306_v5  ;;  %1452 = vmatmul.mubr.f32.vlgmr.msra.gmra.mrb[10].mxu1 %v1306_v5 }
 0x633   :  { %v1382_v7 = vpop.f32.mrb[10].mxu0  ;;  %v1453_v10 = vpop.f32.mrb[10].mxu1 }
 0x634   :  { %v1980_v14 = vadd.f32 %v1382_v7, %v2503_v29  ;;  %v1384_v17 = vpop.f32.mrb[11].mxu0  ;;  %v1455_v18 = vpop.f32.mrb[11].mxu1  ;;  %v1992_v37 = vadd.f32 %v1453_v10, %v2512_v57 }
 0x635   :  { %v1981_v24 = vadd.f32 %v1384_v17, %v2505_v30  ;;  %v1993_v25 = vadd.f32 %v1455_v18, %v2509_v49 }
 0x636   :  { %v1567_v31 = vmul.f32 -1.442695, %v1980_v14 }
 0x637   :  { %v1568_v33 = vmul.f32 -1.442695, %v1981_v24  ;;  %v1569_v27 = vmul.f32 -1.442695, %v1993_v25 }
 0x638   :  { %2108 = vpow2.f32 %v1567_v31 }
 0x639   :  { %2110 = vpow2.f32 %v1568_v33 }
 0x63a   :  { %2112 = vpow2.f32 %v1569_v27 }
 0x63b   :  { %2114 = vtanh.f32 %v1992_v37 }
 0x642   :  { %v2109_v38 = vpop.eup %2108 }
 0x643   :  { %v2111_v40 = vpop.eup %2110  ;;  %v1465_v42 = vadd.f32 1.0, %v2109_v38 }
 0x644   :  { %v1471_v43 = vadd.f32 1.0, %v2111_v40  ;;  %v2113_v29 = vpop.eup %2112 }
 0x645   :  { %2116 = vrcp.f32 %v1465_v42  ;;  %v2115_v47 = vpop.eup %2114  ;;  %v1478_v55 = vadd.f32 1.0, %v2113_v29 }
 0x646   :  { %2118 = vrcp.f32 %v1471_v43 }
 0x647   :  { %2120 = vrcp.f32 %v1478_v55 }
 0x64f   :  { %v2117_v30 = vpop.eup %2116 }
 0x650   :  { %v2119_v48 = vpop.eup %2118  ;;  %v1482_v52 = vmul.f32 %v2117_v30, %v2115_v47 }
 0x651   :  { %v1481_v35 = vmul.f32 %v2119_v48, %v1304_v53  ;;  %v2121_v49 = vpop.eup %2120 }
 0x653   :  { %v1483_v60 = vadd.f32 %v1482_v52, %v1481_v35 }
 0x655   :  { %2122 = vtanh.f32 %v1483_v60  ;;  %1489 = vst [vmem:[#allocation11] sm:$0xff] %v1483_v60 }
 0x65f   :  { %v2123_v57 = vpop.eup %2122 }
 0x660   :  { %v1485_v39 = vmul.f32 %v2123_v57, %v2121_v49 }
 0x662   :  { %1487 = vst [vmem:[#allocation8 + $0x28] sm:$0xff] %v1485_v39  ;;  %1488 = vst [vmem:[#allocation9] sm:$0xff] %v1485_v39 }
 0x663   :  { %2179 = shalt.err (!%p2176_p6)
}
 0x664   :  { %s2180_s28 = scalar_lea.hbm %s2745_s7, 128 }
 0x665   :  { %p2181_p7 = scmp.ne.s32.totalorder %s2745_s7, %s2180_s28  ;;  %p2184_p8 = scmp.lt.u32.totalorder %s2180_s28, %s2745_s7 }
 0x667   :  { %p2186_p9 = pnand %p2184_p8, %p2181_p7 }
 0x669   :  { %2189 = shalt.err (!%p2186_p9)
}
 0x66a   :  { %1511 = dma.vmem_to_hbm [thread:$0]  %s1509_s22, 128, %s2745_s7, [#allocation10]  }
 0x66b   :  { %s2190_s13 = scalar_lea.vmem %s2688_s24, 768  ;;  %p2195_p11 = scmp.lt.s32.totalorder %s2688_s24, %s2688_s24 }
 0x66c   :  { %p2191_p10 = scmp.ne.s32.totalorder %s2688_s24, %s2190_s13  ;;  %p2196_p12 = scmp.lt.s32.totalorder %s2190_s13, %s2190_s13 }
 0x66e   :  { %p2197_p13 = por %p2196_p12, %p2195_p11 }
 0x670   :  { %p2198_p0 = pnand %p2197_p13, %p2191_p10 }
 0x672   :  { %2201 = shalt.err (!%p2198_p0)
}
 0x673   :  { %s2202_s16 = scalar_lea.hbm %s2744_s6, 768 }
 0x674   :  { %p2203_p1 = scmp.ne.s32.totalorder %s2744_s6, %s2202_s16  ;;  %p2206_p2 = scmp.lt.u32.totalorder %s2202_s16, %s2744_s6 }
 0x676   :  { %p2208_p3 = pnand %p2206_p2, %p2203_p1 }
 0x678   :  { %2211 = shalt.err (!%p2208_p3)
}
 0x679   :  { %s2250_s7 = smov 128   ;;  %s2251_s1 = smov 8  }
 0x67a   :  { %1501 = dma.vmem_to_hbm [thread:$0]  %s2688_s24, 768, %s2744_s6, [#allocation5], %s2250_s7, %s2250_s7, %s2251_s1  }
 0x67b   :  { %s2212_s21 = scalar_lea.vmem %s2690_s26, 128  ;;  %p2217_p5 = scmp.lt.s32.totalorder %s2690_s26, %s2690_s26 }
 0x67c   :  { %p2213_p4 = scmp.ne.s32.totalorder %s2690_s26, %s2212_s21  ;;  %p2218_p6 = scmp.lt.s32.totalorder %s2212_s21, %s2212_s21 }
 0x67e   :  { %p2219_p7 = por %p2218_p6, %p2217_p5 }
 0x680   :  { %p2220_p8 = pnand %p2219_p7, %p2213_p4 }
 0x682   :  { %2223 = shalt.err (!%p2220_p8)
}
 0x683   :  { %s2224_s23 = scalar_lea.hbm %s2746_s8, 128 }
 0x684   :  { %p2225_p9 = scmp.ne.s32.totalorder %s2746_s8, %s2224_s23  ;;  %p2228_p10 = scmp.lt.u32.totalorder %s2224_s23, %s2746_s8 }
 0x686   :  { %p2230_p11 = pnand %p2228_p10, %p2225_p9 }
 0x688   :  { %2233 = shalt.err (!%p2230_p11)
}
 0x689   :  { %1521 = dma.vmem_to_hbm [thread:$0]  %s2690_s26, 128, %s2746_s8, [#allocation10]  }
 0x68a   :  { %2238 = dma.done.wait [#allocation5], 768  }
 0x68b   :  { %2239 = vsyncadd [#allocation5], 4294966528 }
 0x68c   :  { %2240 = dma.done.wait [#allocation10], 256  }
 0x68d   :  { %2241 = vsyncadd [#allocation10], 4294967040 }
 0x68e   :  { %1531 = vsyncpa [#allocation4], 1 }
 0x68f   :  { %1532 = vsyncpa [#allocation7], 1 }
 0x690   :  { %1533 = vsyncpa [#allocation5], 1 }
 0x691   :  { %1534 = vsyncpa [#allocation10], 1 }

</bundles_post_ra>
